<compile_context>
chip_gen: v5e
topology: v5e:2x2
jax: 0.10.0
libtpu: 0.0.40
codegen_flags: <defaults>
</compile_context>

<pallas_src>
import jax
import jax.numpy as jnp
from jax import lax
from jax.experimental import pallas as pl
from jax.experimental.pallas import tpu as pltpu


# --------------------------------------------------------------------------
# Tiling helpers
# --------------------------------------------------------------------------
def _choose_cout_tile(COUT):
    """256-wide tiles when they do not inflate lane padding (v6e/v7x MXU is
    2x256^2), otherwise 128 (always legal, fine on v5e)."""
    cands = []
    for t in (256, 128):
        pad = -(-COUT // t) * t - COUT
        cands.append((pad, -t, t))
    return min(cands)[2]


def _row_tiling(HO, WO, min_tiles, max_rows=256):
    """Pick (TILE_H, HO_pad) such that TM = TILE_H*WO is 8-aligned (or covers
    the whole padded extent), TM <= max(max_rows, WO), row padding is minimal,
    and -- when possible -- there are at least `min_tiles` row tiles so both
    v7x TensorCores get work."""
    cap = max(max_rows, WO)                       # always allow one output row
    aligned = [t for t in range(1, HO + 1)
               if t * WO <= cap and (t * WO) % 8 == 0]
    if not aligned:
        # Single full-extent row tile: block == full (padded) dim, always legal.
        return HO, HO

    def key(t):
        n_tiles = -(-HO // t)
        pad = n_tiles * t - HO
        return (0 if n_tiles >= min_tiles else 1, pad, -t)

    tile_h = min(aligned, key=key)
    ho_pad = -(-HO // tile_h) * tile_h
    return tile_h, ho_pad


def _padded_block_bytes(shape, dtype):
    """Approximate VMEM bytes of one pipeline buffer (last two dims padded to
    the native (sublane, 128) tile for `dtype`)."""
    itemsize = jnp.dtype(dtype).itemsize
    sublane = max(8, 32 // max(itemsize, 1))      # f32 -> 8, bf16 -> 16
    dims = list(shape)
    dims[-1] = -(-dims[-1] // 128) * 128
    if len(dims) >= 2:
        dims[-2] = -(-dims[-2] // sublane) * sublane
    n = 1
    for d in dims:
        n *= int(d)
    return n * itemsize


def _vmem_limit_bytes(block_bytes):
    """Computed VMEM budget: double-buffered pipeline blocks + headroom,
    clamped below physical VMEM (64 MiB on v7x, 128 MiB on v5e/v6e)."""
    needed = 2 * sum(block_bytes)                 # double-buffered blocks
    try:
        cap = int(pltpu.get_tpu_info().vmem_capacity_bytes * 4 // 5)
    except Exception:
        cap = 48 * 1024 * 1024                    # conservative: fits v7x 64 MiB
    want = int(needed * 1.5) + (8 << 20)
    return int(max(24 << 20, min(want, max(cap, 24 << 20))))


# --------------------------------------------------------------------------
# Kernel
# --------------------------------------------------------------------------
def _make_conv_relu_kernel(*, CIN, KH, KW, WO, TILE_H, STRIDE, COUT_TILE):
    """Build a Pallas kernel closed over static shape constants."""
    ROWS_IN = (TILE_H - 1) * STRIDE + KH          # input rows per row tile
    H_HI = (TILE_H - 1) * STRIDE + 1
    W_HI = (WO - 1) * STRIDE + 1
    TM = TILE_H * WO                              # matmul M dimension

    def kernel(x_ref, w_ref, b_ref, o_ref):
        # x_ref : (1, HP_pad, WP, CIN)        padded image, resident per batch n
        # w_ref : (KH*KW, CIN, COUT_TILE)     per-tap weights, resident
        # b_ref : (1, COUT_TILE)              f32 bias tile
        # o_ref : (1, TM, COUT_TILE)          lane-dense (>=128-wide) output tile
        j = pl.program_id(2)
        row0 = pl.multiple_of(j * TILE_H * STRIDE, TILE_H * STRIDE)

        # Rows of the padded input needed for this output row tile (incl. halo).
        xwin = x_ref[0, pl.ds(row0, ROWS_IN), :, :]       # (ROWS_IN, WP, CIN)

        # Direct per-tap accumulation: KH*KW matmuls with K = CIN, accumulated
        # in f32.  No im2col slab -> no masked CIN-wide VMEM stores on the
        # critical path; the MXU absorbs the extra passes when CIN < 128.
        # TODO(synk): for stem-style convs (CIN <= 4, stride 2) a wrapper-side
        # space-to-depth / folded-lane layout would make each tap a lane-offset
        # window (pltpu.roll) instead of a sublane-offset value slice.
        acc = jnp.zeros((TM, COUT_TILE), dtype=jnp.float32)
        for kh in range(KH):
            for kw in range(KW):
                tap = xwin[kh:kh + H_HI:STRIDE, kw:kw + W_HI:STRIDE, :]
                lhs = tap.reshape(TM, CIN)                # leading-dim merge only
                acc = acc + jnp.dot(lhs, w_ref[kh * KW + kw],
                                    preferred_element_type=jnp.float32)

        # f32 epilogue: bias + ReLU (bias is already f32 -- no cast).
        acc = acc + b_ref[...]
        o_ref[0] = jnp.maximum(acc, 0.0).astype(o_ref.dtype)

    return kernel


# --------------------------------------------------------------------------
# Wrapper: Conv2d(stride, padding) + ReLU, NCHW in / NCHW out
# --------------------------------------------------------------------------
def conv_module_forward(x_nchw, weight_oihw, bias, *, stride=1, padding=0,
                        matmul_dtype=jnp.bfloat16, out_dtype=None):
    """Forward pass of ConvModule: Conv2d(stride, padding) + ReLU.

    x_nchw      : (N, Cin, H, W)          float32
    weight_oihw : (Cout, Cin, KH, KW)     float32  (PyTorch layout)
    bias        : (Cout,)                 float32
    returns     : (N, Cout, HO, WO)       out_dtype (defaults to x dtype)
    """
    N, CIN, H, W = x_nchw.shape
    COUT, CIN_w, KH, KW = weight_oihw.shape
    assert CIN == CIN_w
    out_dtype = out_dtype or x_nchw.dtype

    HO = (H + 2 * padding - KH) // stride + 1
    WO = (W + 2 * padding - KW) // stride + 1
    assert HO > 0 and WO > 0

    # Lane-dense COUT tiling.
    COUT_TILE = _choose_cout_tile(COUT)
    COUT_pad = -(-COUT // COUT_TILE) * COUT_TILE
    n_ctiles = COUT_pad // COUT_TILE

    # Output-row tiling (M = TILE_H*WO rows per matmul, <= 256).
    min_tiles = 2 if N * n_ctiles < 2 else 1      # keep both v7x cores busy
    TILE_H, HO_pad = _row_tiling(HO, WO, min_tiles)
    n_jtiles = HO_pad // TILE_H
    TM = TILE_H * WO

    # Padded-input geometry: `padding` on all sides plus extra zero rows at the
    # bottom so the last (padded) row tile's halo window exists.
    WP = W + 2 * padding
    HP_pad = (HO_pad - 1) * stride + KH
    extra_rows = HP_pad - (H + 2 * padding)
    assert extra_rows >= 0

    # ---- glue (plain JAX): layout conversion, padding, one-time weight prep ----
    x_nhwc = jnp.transpose(x_nchw, (0, 2, 3, 1))                      # NHWC
    x_pad = jnp.pad(
        x_nhwc,
        ((0, 0), (padding, padding + extra_rows), (padding, padding), (0, 0)),
    ).astype(matmul_dtype)

    # (Cout, Cin, KH, KW) -> (KH, KW, Cin, Cout) -> (KH*KW, Cin, Cout_pad) bf16.
    w_taps = jnp.transpose(weight_oihw, (2, 3, 1, 0)).reshape(KH * KW, CIN, COUT)
    w_taps = jnp.pad(w_taps, ((0, 0), (0, 0), (0, COUT_pad - COUT)))
    w_taps = w_taps.astype(matmul_dtype)
    b_pad = jnp.pad(bias, (0, COUT_pad - COUT)).reshape(1, COUT_pad)
    b_pad = b_pad.astype(jnp.float32)

    kernel = _make_conv_relu_kernel(CIN=CIN, KH=KH, KW=KW, WO=WO,
                                    TILE_H=TILE_H, STRIDE=stride,
                                    COUT_TILE=COUT_TILE)

    # Computed VMEM budget (double-buffered pipeline blocks + headroom).
    block_bytes = [
        _padded_block_bytes((HP_pad, WP, CIN), matmul_dtype),          # input
        _padded_block_bytes((KH * KW, CIN, COUT_TILE), matmul_dtype),  # weights
        _padded_block_bytes((1, COUT_TILE), jnp.float32),              # bias
        _padded_block_bytes((TM, COUT_TILE), jnp.dtype(out_dtype)),    # output
    ]
    vmem_limit = _vmem_limit_bytes(block_bytes)

    # TODO(synk): for very large images (e.g. the 224x224 stem) bound the
    # resident-input footprint on v7x's 64 MiB VMEM with a halo'd row-tile plan
    # (pl.ANY HBM ref + manual double-buffered make_async_copy) or by
    # single-buffering the constant-index input block (pl.Buffered(1)).
    out_flat = pl.pallas_call(
        kernel,
        out_shape=jax.ShapeDtypeStruct((N, HO_pad * WO, COUT_pad), out_dtype),
        grid_spec=pltpu.PrefetchScalarGridSpec(
            num_scalar_prefetch=0,
            grid=(N, n_ctiles, n_jtiles),
            in_specs=[
                # Padded image: constant across (c, j) -> stays resident.
                pl.BlockSpec((1, HP_pad, WP, CIN), lambda n, c, j: (n, 0, 0, 0)),
                # Per-tap weights: depend only on the COUT-tile axis (resident).
                pl.BlockSpec((KH * KW, CIN, COUT_TILE),
                             lambda n, c, j: (0, 0, c)),
                pl.BlockSpec((1, COUT_TILE), lambda n, c, j: (0, c)),
            ],
            out_specs=pl.BlockSpec((1, TM, COUT_TILE),
                                   lambda n, c, j: (n, j, c)),
        ),
        compiler_params=pltpu.CompilerParams(
            dimension_semantics=("parallel", "parallel", "parallel"),
            vmem_limit_bytes=vmem_limit,
        ),
    )(x_pad, w_taps, b_pad)

    # Undo lane / row padding; back to PyTorch's NCHW.
    out = out_flat.reshape(N, HO_pad, WO, COUT_pad)[:, :HO, :, :COUT]
    return jnp.transpose(out, (0, 3, 1, 2)).astype(out_dtype)


# --------------------------------------------------------------------------
# Self-test
# --------------------------------------------------------------------------
if __name__ == "__main__":
    def _run_case(key, N, CIN, H, W, COUT, KSZ, STRIDE, PAD):
        kx, kw, kb = jax.random.split(key, 3)
        x = jax.random.normal(kx, (N, CIN, H, W), dtype=jnp.float32)
        fan_in = CIN * KSZ * KSZ
        bound = 1.0 / (fan_in ** 0.5)
        weight = jax.random.uniform(kw, (COUT, CIN, KSZ, KSZ),
                                    minval=-bound, maxval=bound,
                                    dtype=jnp.float32)
        bias = jax.random.uniform(kb, (COUT,), minval=-bound, maxval=bound,
                                  dtype=jnp.float32)

        out = conv_module_forward(x, weight, bias, stride=STRIDE, padding=PAD)
        out = jax.block_until_ready(out)

        # Reference: XLA f32 conv (same semantics as Conv2d + ReLU).
        ref = lax.conv_general_dilated(
            x, weight, window_strides=(STRIDE, STRIDE),
            padding=[(PAD, PAD), (PAD, PAD)],
            dimension_numbers=("NCHW", "OIHW", "NCHW"),
        ) + bias.reshape(1, COUT, 1, 1)
        ref = jnp.maximum(ref, 0.0)

        HO = (H + 2 * PAD - KSZ) // STRIDE + 1
        WO = (W + 2 * PAD - KSZ) // STRIDE + 1
        assert out.shape == (N, COUT, HO, WO), out.shape
        # bf16 matmul operands (f32 accumulation) -> loosened tolerance.
        err = float(jnp.max(jnp.abs(out - ref)))
        assert jnp.allclose(out, ref, atol=2e-2, rtol=2e-2), err

    key = jax.random.PRNGKey(0)
    k1, k2 = jax.random.split(key)

    # Primary small case matching the module: Conv2d(4 -> 8, k=3, s=1, p=1).
    _run_case(k1, N=2, CIN=4, H=16, W=16, COUT=8, KSZ=3, STRIDE=1, PAD=1)
    # Secondary case: no padding, multiple row tiles, N = 1 (megacore path).
    _run_case(k2, N=1, CIN=16, H=10, W=10, COUT=32, KSZ=3, STRIDE=1, PAD=0)

    print("KERNEL_OK")
</pallas_src>

<mosaic_0001>
module attributes {stable_mosaic.version = 11 : i64} {
  func.func @kernel(%arg0: i32, %arg1: i32, %arg2: i32, %arg3: memref<1x18x18x4xbf16, #tpu.memory_space<vmem>>, %arg4: memref<9x4x128xbf16, #tpu.memory_space<vmem>>, %arg5: memref<1x128xf32, #tpu.memory_space<vmem>>, %arg6: memref<1x256x128xf32, #tpu.memory_space<vmem>>) attributes {dimension_semantics = [#tpu.dimension_semantics<parallel>, #tpu.dimension_semantics<parallel>, #tpu.dimension_semantics<parallel>], iteration_bounds = array<i64: 2, 1, 1>, scalar_prefetch = 0 : i64, scratch_operands = 0 : i64, tpu.core_type = #tpu.core_type<tc>, window_params = [{transform_indices = @transform_0, window_bounds = array<i64: 1, 18, 18, 4>}, {transform_indices = @transform_1, window_bounds = array<i64: 9, 4, 128>}, {transform_indices = @transform_2, window_bounds = array<i64: 1, 128>}, {transform_indices = @transform_3, window_bounds = array<i64: 1, 256, 128>}]} {
    %c16_i32 = arith.constant 16 : i32
    %0 = arith.muli %arg2, %c16_i32 : i32
    %c1_i32 = arith.constant 1 : i32
    %1 = arith.muli %0, %c1_i32 : i32
    %2 = tpu.assume_multiple %1, 16 : i32
    %c0 = arith.constant 0 : index
    %3 = arith.index_cast %2 : i32 to index
    %c0_0 = arith.constant 0 : index
    %c0_1 = arith.constant 0 : index
    %4 = vector.load %arg3[%c0, %3, %c0_0, %c0_1] : memref<1x18x18x4xbf16, #tpu.memory_space<vmem>>, vector<1x18x18x4xbf16>
    %5 = vector.shape_cast %4 : vector<1x18x18x4xbf16> to vector<18x18x4xbf16>
    %cst = arith.constant 0.000000e+00 : f32
    %6 = vector.broadcast %cst : f32 to vector<256x128xf32>
    %7 = vector.extract_strided_slice %5 {offsets = [0, 0, 0], sizes = [16, 16, 4], strides = [1, 1, 1]} : vector<18x18x4xbf16> to vector<16x16x4xbf16>
    %8 = vector.shape_cast %7 : vector<16x16x4xbf16> to vector<256x4xbf16>
    %c0_2 = arith.constant 0 : index
    %c0_3 = arith.constant 0 : index
    %c0_4 = arith.constant 0 : index
    %9 = vector.load %arg4[%c0_2, %c0_3, %c0_4] : memref<9x4x128xbf16, #tpu.memory_space<vmem>>, vector<1x4x128xbf16>
    %10 = vector.shape_cast %9 : vector<1x4x128xbf16> to vector<4x128xbf16>
    %cst_5 = arith.constant dense<0.000000e+00> : vector<256x128xf32>
    %11 = tpu.matmul %8, %10, %cst_5 {dimension_numbers = #tpu.dot_dimension_numbers<[1], [0], [0], [1], [0, 0, 1, 1], [], []>} : vector<256x4xbf16>, vector<4x128xbf16>, vector<256x128xf32> -> vector<256x128xf32>
    %12 = arith.addf %6, %11 : vector<256x128xf32>
    %13 = vector.extract_strided_slice %5 {offsets = [0, 1, 0], sizes = [16, 16, 4], strides = [1, 1, 1]} : vector<18x18x4xbf16> to vector<16x16x4xbf16>
    %14 = vector.shape_cast %13 : vector<16x16x4xbf16> to vector<256x4xbf16>
    %c1 = arith.constant 1 : index
    %c0_6 = arith.constant 0 : index
    %c0_7 = arith.constant 0 : index
    %15 = vector.load %arg4[%c1, %c0_6, %c0_7] : memref<9x4x128xbf16, #tpu.memory_space<vmem>>, vector<1x4x128xbf16>
    %16 = vector.shape_cast %15 : vector<1x4x128xbf16> to vector<4x128xbf16>
    %cst_8 = arith.constant dense<0.000000e+00> : vector<256x128xf32>
    %17 = tpu.matmul %14, %16, %cst_8 {dimension_numbers = #tpu.dot_dimension_numbers<[1], [0], [0], [1], [0, 0, 1, 1], [], []>} : vector<256x4xbf16>, vector<4x128xbf16>, vector<256x128xf32> -> vector<256x128xf32>
    %18 = arith.addf %12, %17 : vector<256x128xf32>
    %19 = vector.extract_strided_slice %5 {offsets = [0, 2, 0], sizes = [16, 16, 4], strides = [1, 1, 1]} : vector<18x18x4xbf16> to vector<16x16x4xbf16>
    %20 = vector.shape_cast %19 : vector<16x16x4xbf16> to vector<256x4xbf16>
    %c2 = arith.constant 2 : index
    %c0_9 = arith.constant 0 : index
    %c0_10 = arith.constant 0 : index
    %21 = vector.load %arg4[%c2, %c0_9, %c0_10] : memref<9x4x128xbf16, #tpu.memory_space<vmem>>, vector<1x4x128xbf16>
    %22 = vector.shape_cast %21 : vector<1x4x128xbf16> to vector<4x128xbf16>
    %cst_11 = arith.constant dense<0.000000e+00> : vector<256x128xf32>
    %23 = tpu.matmul %20, %22, %cst_11 {dimension_numbers = #tpu.dot_dimension_numbers<[1], [0], [0], [1], [0, 0, 1, 1], [], []>} : vector<256x4xbf16>, vector<4x128xbf16>, vector<256x128xf32> -> vector<256x128xf32>
    %24 = arith.addf %18, %23 : vector<256x128xf32>
    %25 = vector.extract_strided_slice %5 {offsets = [1, 0, 0], sizes = [16, 16, 4], strides = [1, 1, 1]} : vector<18x18x4xbf16> to vector<16x16x4xbf16>
    %26 = vector.shape_cast %25 : vector<16x16x4xbf16> to vector<256x4xbf16>
    %c3 = arith.constant 3 : index
    %c0_12 = arith.constant 0 : index
    %c0_13 = arith.constant 0 : index
    %27 = vector.load %arg4[%c3, %c0_12, %c0_13] : memref<9x4x128xbf16, #tpu.memory_space<vmem>>, vector<1x4x128xbf16>
    %28 = vector.shape_cast %27 : vector<1x4x128xbf16> to vector<4x128xbf16>
    %cst_14 = arith.constant dense<0.000000e+00> : vector<256x128xf32>
    %29 = tpu.matmul %26, %28, %cst_14 {dimension_numbers = #tpu.dot_dimension_numbers<[1], [0], [0], [1], [0, 0, 1, 1], [], []>} : vector<256x4xbf16>, vector<4x128xbf16>, vector<256x128xf32> -> vector<256x128xf32>
    %30 = arith.addf %24, %29 : vector<256x128xf32>
    %31 = vector.extract_strided_slice %5 {offsets = [1, 1, 0], sizes = [16, 16, 4], strides = [1, 1, 1]} : vector<18x18x4xbf16> to vector<16x16x4xbf16>
    %32 = vector.shape_cast %31 : vector<16x16x4xbf16> to vector<256x4xbf16>
    %c4 = arith.constant 4 : index
    %c0_15 = arith.constant 0 : index
    %c0_16 = arith.constant 0 : index
    %33 = vector.load %arg4[%c4, %c0_15, %c0_16] : memref<9x4x128xbf16, #tpu.memory_space<vmem>>, vector<1x4x128xbf16>
    %34 = vector.shape_cast %33 : vector<1x4x128xbf16> to vector<4x128xbf16>
    %cst_17 = arith.constant dense<0.000000e+00> : vector<256x128xf32>
    %35 = tpu.matmul %32, %34, %cst_17 {dimension_numbers = #tpu.dot_dimension_numbers<[1], [0], [0], [1], [0, 0, 1, 1], [], []>} : vector<256x4xbf16>, vector<4x128xbf16>, vector<256x128xf32> -> vector<256x128xf32>
    %36 = arith.addf %30, %35 : vector<256x128xf32>
    %37 = vector.extract_strided_slice %5 {offsets = [1, 2, 0], sizes = [16, 16, 4], strides = [1, 1, 1]} : vector<18x18x4xbf16> to vector<16x16x4xbf16>
    %38 = vector.shape_cast %37 : vector<16x16x4xbf16> to vector<256x4xbf16>
    %c5 = arith.constant 5 : index
    %c0_18 = arith.constant 0 : index
    %c0_19 = arith.constant 0 : index
    %39 = vector.load %arg4[%c5, %c0_18, %c0_19] : memref<9x4x128xbf16, #tpu.memory_space<vmem>>, vector<1x4x128xbf16>
    %40 = vector.shape_cast %39 : vector<1x4x128xbf16> to vector<4x128xbf16>
    %cst_20 = arith.constant dense<0.000000e+00> : vector<256x128xf32>
    %41 = tpu.matmul %38, %40, %cst_20 {dimension_numbers = #tpu.dot_dimension_numbers<[1], [0], [0], [1], [0, 0, 1, 1], [], []>} : vector<256x4xbf16>, vector<4x128xbf16>, vector<256x128xf32> -> vector<256x128xf32>
    %42 = arith.addf %36, %41 : vector<256x128xf32>
    %43 = vector.extract_strided_slice %5 {offsets = [2, 0, 0], sizes = [16, 16, 4], strides = [1, 1, 1]} : vector<18x18x4xbf16> to vector<16x16x4xbf16>
    %44 = vector.shape_cast %43 : vector<16x16x4xbf16> to vector<256x4xbf16>
    %c6 = arith.constant 6 : index
    %c0_21 = arith.constant 0 : index
    %c0_22 = arith.constant 0 : index
    %45 = vector.load %arg4[%c6, %c0_21, %c0_22] : memref<9x4x128xbf16, #tpu.memory_space<vmem>>, vector<1x4x128xbf16>
    %46 = vector.shape_cast %45 : vector<1x4x128xbf16> to vector<4x128xbf16>
    %cst_23 = arith.constant dense<0.000000e+00> : vector<256x128xf32>
    %47 = tpu.matmul %44, %46, %cst_23 {dimension_numbers = #tpu.dot_dimension_numbers<[1], [0], [0], [1], [0, 0, 1, 1], [], []>} : vector<256x4xbf16>, vector<4x128xbf16>, vector<256x128xf32> -> vector<256x128xf32>
    %48 = arith.addf %42, %47 : vector<256x128xf32>
    %49 = vector.extract_strided_slice %5 {offsets = [2, 1, 0], sizes = [16, 16, 4], strides = [1, 1, 1]} : vector<18x18x4xbf16> to vector<16x16x4xbf16>
    %50 = vector.shape_cast %49 : vector<16x16x4xbf16> to vector<256x4xbf16>
    %c7 = arith.constant 7 : index
    %c0_24 = arith.constant 0 : index
    %c0_25 = arith.constant 0 : index
    %51 = vector.load %arg4[%c7, %c0_24, %c0_25] : memref<9x4x128xbf16, #tpu.memory_space<vmem>>, vector<1x4x128xbf16>
    %52 = vector.shape_cast %51 : vector<1x4x128xbf16> to vector<4x128xbf16>
    %cst_26 = arith.constant dense<0.000000e+00> : vector<256x128xf32>
    %53 = tpu.matmul %50, %52, %cst_26 {dimension_numbers = #tpu.dot_dimension_numbers<[1], [0], [0], [1], [0, 0, 1, 1], [], []>} : vector<256x4xbf16>, vector<4x128xbf16>, vector<256x128xf32> -> vector<256x128xf32>
    %54 = arith.addf %48, %53 : vector<256x128xf32>
    %55 = vector.extract_strided_slice %5 {offsets = [2, 2, 0], sizes = [16, 16, 4], strides = [1, 1, 1]} : vector<18x18x4xbf16> to vector<16x16x4xbf16>
    %56 = vector.shape_cast %55 : vector<16x16x4xbf16> to vector<256x4xbf16>
    %c8 = arith.constant 8 : index
    %c0_27 = arith.constant 0 : index
    %c0_28 = arith.constant 0 : index
    %57 = vector.load %arg4[%c8, %c0_27, %c0_28] : memref<9x4x128xbf16, #tpu.memory_space<vmem>>, vector<1x4x128xbf16>
    %58 = vector.shape_cast %57 : vector<1x4x128xbf16> to vector<4x128xbf16>
    %cst_29 = arith.constant dense<0.000000e+00> : vector<256x128xf32>
    %59 = tpu.matmul %56, %58, %cst_29 {dimension_numbers = #tpu.dot_dimension_numbers<[1], [0], [0], [1], [0, 0, 1, 1], [], []>} : vector<256x4xbf16>, vector<4x128xbf16>, vector<256x128xf32> -> vector<256x128xf32>
    %60 = arith.addf %54, %59 : vector<256x128xf32>
    %c0_30 = arith.constant 0 : index
    %c0_31 = arith.constant 0 : index
    %61 = vector.load %arg5[%c0_30, %c0_31] : memref<1x128xf32, #tpu.memory_space<vmem>>, vector<1x128xf32>
    %62 = vector.broadcast %61 : vector<1x128xf32> to vector<256x128xf32>
    %63 = arith.addf %60, %62 : vector<256x128xf32>
    %cst_32 = arith.constant 0.000000e+00 : f32
    %64 = vector.broadcast %cst_32 : f32 to vector<256x128xf32>
    %65 = arith.maximumf %63, %64 : vector<256x128xf32>
    %c0_33 = arith.constant 0 : index
    %c0_34 = arith.constant 0 : index
    %c0_35 = arith.constant 0 : index
    %66 = vector.load %arg6[%c0_33, %c0_34, %c0_35] : memref<1x256x128xf32, #tpu.memory_space<vmem>>, vector<1x256x128xf32>
    %67 = vector.shape_cast %66 : vector<1x256x128xf32> to vector<256x128xf32>
    %68 = vector.shape_cast %65 : vector<256x128xf32> to vector<1x256x128xf32>
    tpu.vector_store %arg6[%c0_33, %c0_34, %c0_35], %68 {strides = array<i32>} : memref<1x256x128xf32, #tpu.memory_space<vmem>>, vector<1x256x128xf32>,
    return
  }
  func.func @transform_0(%arg0: i32, %arg1: i32, %arg2: i32) -> (i32, i32, i32, i32) {
    %c0_i32 = arith.constant 0 : i32
    %c0_i32_0 = arith.constant 0 : i32
    %c0_i32_1 = arith.constant 0 : i32
    %c0_i32_2 = arith.constant 0 : i32
    return %arg0, %c0_i32, %c0_i32_0, %c0_i32_1 : i32, i32, i32, i32
  }
  func.func @transform_1(%arg0: i32, %arg1: i32, %arg2: i32) -> (i32, i32, i32) {
    %c0_i32 = arith.constant 0 : i32
    %c0_i32_0 = arith.constant 0 : i32
    %c0_i32_1 = arith.constant 0 : i32
    return %c0_i32, %c0_i32_0, %arg1 : i32, i32, i32
  }
  func.func @transform_2(%arg0: i32, %arg1: i32, %arg2: i32) -> (i32, i32) {
    %c0_i32 = arith.constant 0 : i32
    %c0_i32_0 = arith.constant 0 : i32
    return %c0_i32, %arg1 : i32, i32
  }
  func.func @transform_3(%arg0: i32, %arg1: i32, %arg2: i32) -> (i32, i32, i32) {
    %c0_i32 = arith.constant 0 : i32
    return %arg0, %arg2, %arg1 : i32, i32, i32
  }
}

</mosaic_0001>

<bundles_post_ra>
// kernel: tpu_custom_call.1
= control target key start
LH: loop header
LB: loop body
LE: loop exit
PB: predicated region body
PF: predicated region fallthrough
CT: control target
= control target key end

     0   :  { %8 = vsyncpa [#allocation3], 0  ;;  %s4186_s0 = inlined_call_operand.vmem [shape: bf16[2,18,18,4], index: 0, kind: input, shape index: {}]   ;;  %s4187_s1 = inlined_call_operand.vmem [shape: bf16[9,4,128], index: 1, kind: input, shape index: {}]   ;;  %s4188_s2 = inlined_call_operand.vmem [shape: f32[1,128], index: 2, kind: input, shape index: {}]   ;;  %s4189_s3 = inlined_call_operand.hbm [shape: f32[2,256,128], index: 3, kind: output, shape index: {}]  }
   0x1   :  { %10 = vsyncpa [#allocation3 + $0x1], 0  ;;  %s2968_s12 = smov 0   ;;  %s2970_s13 = smov 0  }
   0x2   :  { %s2972_s14 = smov 0   ;;  %s2974_s15 = smov 0  }
   0x3   :  { %s2976_s16 = smov 0   ;;  %s2978_s17 = smov 0  }
   0x4 LB: > { %s2521_s18 = sadd.s32 4294967295, %s2944_s17   ;;  %s2522_s19 = sadd.s32 4294967294, %s2944_s17   ;;  %s2944_s17 = sphi %s2978_s17, %s16_s17   ;;  %s2940_s16 = sphi %s2976_s16, %s4334_s16   ;;  %s2936_s15 = sphi %s2974_s15, %s4333_s15   ;;  %s2932_s14 = sphi %s2972_s14, %s4332_s14   ;;  %s2928_s13 = sphi %s2970_s13, %s4331_s13   ;;  %s2924_s12 = sphi %s2968_s12, %s4330_s12  }
   0x5   : > { %s35_s20 = sadd.s32 1, %s2940_s16  ;;  %s124_s21 = sadd.s32 1, %s2932_s14 }
   0x6   : > { %p37_p0 = scmp.ge.s32.totalorder %s35_s20, 2  ;;  %p134_p1 = scmp.ne.s32.totalorder %s2932_s14, %s2928_s13 }
   0x7   : > { %p135_p2 = scmp.eq.s32.totalorder %s2521_s18, 1  ;;  %p140_p3 = scmp.ne.s32.totalorder %s2928_s13, %s2924_s12 }
   0x8   : > { %s4336_s20 = smov (%p37_p0, %s35_s20), 0  ;;  %p141_p5 = scmp.eq.s32.totalorder %s2522_s19, 1 }
   0x9   : > { %p3008_p4 = por %p135_p2, %p134_p1  ;;  %s117_s23 = ssub.s32 %s2940_s16, %s4336_s20 }
   0xa   : > { %p2527_p6 = scmp.ge.s32.totalorder %s2944_s17, 1  ;;  %p122_p7 = scmp.eq.s32.totalorder %s117_s23, 0 }
   0xb   : > { %p3015_p8 = por %p141_p5, %p140_p3  ;;  %p180_p9 = scmp.lt.s32.totalorder %s2944_s17, 3 }
   0xc   : > { %s3021_s25 = scalar_select %p122_p7, %s2932_s14, %s124_s21  }
   0xd   : > { %p181_p10 = pnand %p2527_p6, %p180_p9 }
   0xf   : > { %184 = sbr.rel (%p181_p10) target bundleno = 771 (0x303), region = 32 }
  0x14   : > { %v2530_v0 = vld [vmem:[%s4187_s1 + $0x2] sm:$0x3]  ;;  %vm770_vm0 = vcmask 1041408   ;;  %p211_p11 = scmp.lt.s32.totalorder %s2936_s15, 1  ;;  %v2643_v2 = vld [vmem:[%s4187_s1 + $0x4] sm:$0x3] }
  0x15   : > { %v772_v1 = vsel %vm770_vm0, %v2530_v0, 0  ;;  %v1313_v3 = vsel %vm770_vm0, %v2643_v2, 0  ;;  %v2660_v4 = vld [vmem:[%s4187_s1 + $0x6] sm:$0x3]  ;;  %v283_v5 = vld [vmem:[%s4187_s1] sm:$0x3] }
  0x16   : > { %2796 = vmatpush.bf16.msra.mxu1 %v772_v1  ;;  %2797 = vmatpush.bf16.msra.mxu2 %v772_v1  ;;  %s212_s30 = scalar_select %p211_p11, %s2936_s15, 1  ;;  %v2681_v6 = vld [vmem:[%s4187_s1 + $0x8] sm:$0x3]  ;;  %v1447_v7 = vsel %vm770_vm0, %v2660_v4, 0  ;;  %v992_v8 = vsel %vm770_vm0, %v283_v5, 0  ;;  %vm721_vm4 = vcmask 31744  }
  0x17   : > { %2798 = vmatpush.bf16.msra.mxu3 %v772_v1  ;;  %781 = vmatpush.bf16.msra.mxu0 %v772_v1  ;;  %v1603_v9 = vsel %vm770_vm0, %v2681_v6, 0  ;;  %vm284_vm1 = vsmask.f32 3328  ;;  %vm285_vm2 = vsmask.f32 7440  ;;  %vm1099_vm5 = vcmask 1042432  }
  0x18   : > { %s2799_s10 = smul.u32 216, %s212_s30  ;;  %vm3075_vm3 = vmor %vm284_vm1, %vm285_vm2  ;;  %vm1100_vm6 = vcmask 1046532   ;;  %s208_s5 = sand.u32 1, %s2928_s13  }
  0x19   : > { %vm3378_vm7 = vmor %vm1099_vm5, %vm1100_vm6  ;;  %s2528_s8 = sshll.u32 %s208_s5, 8  ;;  %s2886_s30 = scalar_lea.hbm %s4189_s3, 512 }
  0x1a   : > { %1322 = vmatpush.bf16.msrb.mxu2 %v1313_v3  ;;  %1001 = vmatpush.bf16.msrb.mxu1 %v992_v8  ;;  %s3048_s19 = scalar_lea.vmem %s4186_s0, %s2799_s10  ;;  %s3976_s9 = scalar_lea.vmem [#allocation2], %s2528_s8 }
  0x1b   : > { %1456 = vmatpush.bf16.msrb.mxu3 %v1447_v7  ;;  %1612 = vmatpush.bf16.msrb.mxu0 %v1603_v9  ;;  %v3051_v10 = vld [vmem:[%s3048_s19 + $0x30] sm:$0xf]  ;;  %v3054_v11 = vld [vmem:[%s3048_s19 + $0x34] sm:$0xf]  ;;  %v3057_v12 = vld [vmem:[%s3048_s19 + $0x38] sm:$0x1] }
  0x1c   : > { %v384_v13 = vshrl.u32 %v3051_v10, 16  ;;  %v387_v14 = vshll.u32 %v3051_v10, 16  ;;  %v393_v15 = vshll.u32 %v3054_v11, 16  ;;  %v397_v16 = vshrl.u32 %v3054_v11, 16  ;;  %v253_v17 = vld [vmem:[%s3048_s19 + $0x60] sm:$0xf] }
  0x1d   : > { %v403_v18 = vshll.u32 %v3057_v12, 16  ;;  %v3066_v19 = vld [vmem:[%s3048_s19 + $0x64] sm:$0xf]  ;;  %v255_v20 = vld [vmem:[%s3048_s19 + $0x68] sm:$0x1]  ;;  %v480_v21 = vshrl.u32 %v253_v17, 16 }
  0x1e   : > { %v386_v22 = vrot.slane %v384_v13, 4  ;;  %v389_v23 = vrot.slane %v387_v14, 5  ;;  %v395_v24 = vrot.slane %v393_v15, 5  ;;  %v399_v25 = vrot.slane %v397_v16, 4  ;;  %v265_v26 = vld [vmem:[%s3048_s19 + $0x90] sm:$0xf] }
  0x1f   : > { %v405_v27 = vrot.slane %v403_v18, 5  ;;  %v482_v28 = vrot.slane %v480_v21, 4  ;;  %v483_v29 = vshll.u32 %v253_v17, 16  ;;  %v489_v30 = vshll.u32 %v3066_v19, 16  ;;  %v266_v35 = vld [vmem:[%s3048_s19 + $0x94] sm:$0xf] }
  0x20   : > { %v390_v31 = vor.u32 %v389_v23, %v386_v22  ;;  %v400_v32 = vor.u32 %v399_v25, %v395_v24  ;;  %v493_v33 = vshrl.u32 %v3066_v19, 16  ;;  %v499_v34 = vshll.u32 %v255_v20, 16  ;;  %v267_v45 = vld [vmem:[%s3048_s19 + $0x98] sm:$0x1]  ;;  %v3085_v61 = vld [vmem:[%s3048_s19] sm:$0xf] }
  0x21   : > { %v485_v37 = vrot.slane %v483_v29, 5  ;;  %v491_v38 = vrot.slane %v489_v30, 5  ;;  %v576_v39 = vshrl.u32 %v265_v26, 16  ;;  %v579_v47 = vshll.u32 %v265_v26, 16  ;;  %v3092_v1 = vld [vmem:[%s3048_s19 + $0x4] sm:$0xf] }
  0x22   : > { %v391_v40 = vrot.slane %v390_v31, 4  ;;  %v401_v41 = vrot.slane %v400_v32, 4  ;;  %v495_v42 = vrot.slane %v493_v33, 4  ;;  %v501_v43 = vrot.slane %v499_v34, 5  ;;  %v3095_v2 = vld [vmem:[%s3048_s19 + $0x8] sm:$0x1] }
  0x23   : > { %v486_v44 = vor.u32 %v485_v37, %v482_v28  ;;  %v578_v46 = vrot.slane %v576_v39, 4  ;;  %v585_v48 = vshll.u32 %v266_v35, 16  ;;  %v589_v52 = vshrl.u32 %v266_v35, 16  ;;  %v3111_v23 = vld [vmem:[%s3048_s19 + $0x3c] sm:$0xf]  ;;  %s2795_s10 = sshll.u32 %s2936_s15, 8 }
  0x24   : > { %v396_v49 = vsel %vm3075_vm3, %v391_v40, %v395_v24  ;;  %v406_v50 = vsel %vm3075_vm3, %v401_v41, %v405_v27  ;;  %v496_v51 = vor.u32 %v495_v42, %v491_v38  ;;  %v581_v56 = vrot.slane %v579_v47, 5  ;;  %v3114_v24 = vld [vmem:[%s3048_s19 + $0x40] sm:$0xf]  ;;  %v3119_v29 = vld [vmem:[%s3048_s19 + $0x44] sm:$0x1]  ;;  %s2412_s21 = sshll.u32 %s3976_s9, 4  ;;  %s2413_s21 = int_to_ptr.vmem [resolvable:$true] %s2412_s21 }
  0x25   : > { %v681_v53 = vunpack.c.l.b16 %v396_v49  ;;  %v682_v54 = vunpack.c.l.b16 %v406_v50  ;;  %v487_v55 = vrot.slane %v486_v44, 4  ;;  %v587_v58 = vrot.slane %v585_v48, 5  ;;  %v3134_v47 = vld [vmem:[%s3048_s19 + $0x70] sm:$0xf]  ;;  %s2397_s15 = scalar_lea.sflag [#allocation3], %s208_s5 }
  0x26   : > { %v497_v57 = vrot.slane %v496_v51, 4  ;;  %v591_v59 = vrot.slane %v589_v52, 4  ;;  %v595_v60 = vshll.u32 %v267_v45, 16  ;;  %v582_v0 = vor.u32 %v581_v56, %v578_v46  ;;  %v3141_v51 = vld [vmem:[%s3048_s19 + $0x74] sm:$0x1] }
  0x27   : > { %v3087_v62 = vpack.c.b16 %v682_v54, %v681_v53  ;;  %v492_v63 = vsel %vm3075_vm3, %v487_v55, %v491_v38  ;;  %v288_v9 = vshrl.u32 %v3085_v61, 16  ;;  %v291_v13 = vshll.u32 %v3085_v61, 16  ;;  %v3127_v38 = vld [vmem:[%s3048_s19 + $0x6c] sm:$0xf] }
  0x28   : > { %v502_v3 = vsel %vm3075_vm3, %v497_v57, %v501_v43  ;;  %v689_v4 = vunpack.c.l.b16 %v492_v63  ;;  %v592_v5 = vor.u32 %v591_v59, %v587_v58  ;;  %v597_v6 = vrot.slane %v595_v60, 5 }
  0x29   : > { %2535 = vmatmul.msk.bf16.vlgmr.msra.gmra.mxu1 %vm721_vm4, %v3087_v62  ;;  %v690_v7 = vunpack.c.l.b16 %v502_v3  ;;  %v583_v8 = vrot.slane %v582_v0, 4  ;;  %v297_v15 = vshll.u32 %v3092_v1, 16  ;;  %v301_v16 = vshrl.u32 %v3092_v1, 16 }
  0x2a   : > { %v593_v14 = vrot.slane %v592_v5, 4  ;;  %v307_v17 = vshll.u32 %v3095_v2, 16  ;;  %v290_v21 = vrot.slane %v288_v9, 4  ;;  %v293_v22 = vrot.slane %v291_v13, 5  ;;  %v268_v5 = vld [vmem:[%s3048_s19 + $0x9c] sm:$0xf] }
  0x2b   : > { %v3106_v18 = vpack.c.b16 %v690_v7, %v689_v4  ;;  %v588_v20 = vsel %vm3075_vm3, %v583_v8, %v587_v58  ;;  %v299_v27 = vrot.slane %v297_v15, 5  ;;  %v303_v28 = vrot.slane %v301_v16, 4  ;;  %v269_v9 = vld [vmem:[%s3048_s19 + $0xa0] sm:$0xf] }
  0x2c   : > { %v598_v25 = vsel %vm3075_vm3, %v593_v14, %v597_v6  ;;  %v697_v26 = vunpack.c.l.b16 %v588_v20  ;;  %v294_v31 = vor.u32 %v293_v22, %v290_v21  ;;  %v309_v32 = vrot.slane %v307_v17, 5  ;;  %v270_v17 = vld [vmem:[%s3048_s19 + $0xa4] sm:$0x1] }
  0x2d   : > { %4234 = vst [vmem:[#allocation5_spill] sm:$0xff] %v3106_v18  ;;  %2539 = vmatmul.msk.bf16.vlgmr.msra.gmra.mxu2 %vm721_vm4, %v3106_v18  ;;  %v698_v30 = vunpack.c.l.b16 %v598_v25  ;;  %v304_v33 = vor.u32 %v303_v28, %v299_v27  ;;  %v408_v34 = vshrl.u32 %v3111_v23, 16  ;;  %v411_v35 = vshll.u32 %v3111_v23, 16 }
  0x2e   : > { %v417_v37 = vshll.u32 %v3114_v24, 16  ;;  %v295_v40 = vrot.slane %v294_v31, 4  ;;  %v421_v41 = vshrl.u32 %v3114_v24, 16  ;;  %v427_v42 = vshll.u32 %v3119_v29, 16 }
  0x2f   : > { %v3129_v39 = vpack.c.b16 %v698_v30, %v697_v26  ;;  %v305_v43 = vrot.slane %v304_v33, 4  ;;  %v410_v44 = vrot.slane %v408_v34, 4  ;;  %v413_v45 = vrot.slane %v411_v35, 5  ;;  %v3159_v35 = vld [vmem:[%s3048_s19 + $0xc] sm:$0xf] }
  0x30   : > { %v419_v46 = vrot.slane %v417_v37, 5  ;;  %v300_v48 = vsel %vm3075_vm3, %v295_v40, %v299_v27  ;;  %v423_v49 = vrot.slane %v421_v41, 4  ;;  %v429_v50 = vrot.slane %v427_v42, 5 }
  0x31   : > { %4235 = vst [vmem:[#allocation6_spill] sm:$0xff] %v3129_v39  ;;  %2543 = vmatmul.msk.bf16.vlgmr.msra.gmra.mxu3 %vm721_vm4, %v3129_v39  ;;  %v504_v52 = vshrl.u32 %v3127_v38, 16  ;;  %v310_v53 = vsel %vm3075_vm3, %v305_v43, %v309_v32  ;;  %v673_v54 = vunpack.c.l.b16 %v300_v48  ;;  %v414_v55 = vor.u32 %v413_v45, %v410_v44  ;;  %v3166_v43 = vld [vmem:[%s3048_s19 + $0x10] sm:$0xf]  ;;  %v3169_v48 = vld [vmem:[%s3048_s19 + $0x14] sm:$0x1] }
  0x32   : > { %v507_v56 = vshll.u32 %v3127_v38, 16  ;;  %v674_v57 = vunpack.c.l.b16 %v310_v53  ;;  %v424_v58 = vor.u32 %v423_v49, %v419_v46  ;;  %v513_v60 = vshll.u32 %v3134_v47, 16  ;;  %v3346_v39 = vld [vmem:[%s3048_s19 + $0x2c] sm:$0x1] }
  0x33   : > { %v506_v59 = vrot.slane %v504_v52, 4  ;;  %v415_v63 = vrot.slane %v414_v55, 4  ;;  %v517_v3 = vshrl.u32 %v3134_v47, 16  ;;  %v523_v4 = vshll.u32 %v3141_v51, 16 }
  0x34   : > { %v509_v0 = vrot.slane %v507_v56, 5  ;;  %v705_v6 = vpack.c.b16 %v674_v57, %v673_v54  ;;  %v425_v7 = vrot.slane %v424_v58, 4  ;;  %v515_v8 = vrot.slane %v513_v60, 5  ;;  %v3179_v58 = vld [vmem:[%s3048_s19 + $0x48] sm:$0xf] }
  0x35   : > { %v420_v13 = vsel %vm3075_vm3, %v415_v63, %v419_v46  ;;  %v519_v15 = vrot.slane %v517_v3, 4  ;;  %v525_v16 = vrot.slane %v523_v4, 5  ;;  %v600_v22 = vshrl.u32 %v268_v5, 16  ;;  %v3184_v3 = vld [vmem:[%s3048_s19 + $0x4c] sm:$0xf] }
  0x36   : > { %v510_v14 = vor.u32 %v509_v0, %v506_v59  ;;  %2531 = vmatmul.msk.bf16.vlgmr.msra.gmra.mxu0 %vm721_vm4, %v705_v6  ;;  %v430_v20 = vsel %vm3075_vm3, %v425_v7, %v429_v50  ;;  %v683_v21 = vunpack.c.l.b16 %v420_v13  ;;  %v603_v25 = vshll.u32 %v268_v5, 16 }
  0x37   : > { %v684_v26 = vunpack.c.l.b16 %v430_v20  ;;  %v520_v28 = vor.u32 %v519_v15, %v515_v8  ;;  %v609_v30 = vshll.u32 %v269_v9, 16  ;;  %v602_v31 = vrot.slane %v600_v22, 4  ;;  %v3191_v15 = vld [vmem:[%s3048_s19 + $0x50] sm:$0x1] }
  0x38   : > { %v511_v27 = vrot.slane %v510_v14, 4  ;;  %v605_v32 = vrot.slane %v603_v25, 5  ;;  %v613_v33 = vshrl.u32 %v269_v9, 16  ;;  %v619_v34 = vshll.u32 %v270_v17, 16 }
  0x39   : > { %v3161_v37 = vpack.c.b16 %v684_v26, %v683_v21  ;;  %v521_v41 = vrot.slane %v520_v28, 4  ;;  %v611_v42 = vrot.slane %v609_v30, 5  ;;  %v312_v52 = vshrl.u32 %v3159_v35, 16  ;;  %v3202_v28 = vld [vmem:[%s3048_s19 + $0x78] sm:$0xf] }
  0x3a   : > { %v516_v40 = vsel %vm3075_vm3, %v511_v27, %v515_v8  ;;  %v606_v45 = vor.u32 %v605_v32, %v602_v31  ;;  %v615_v46 = vrot.slane %v613_v33, 4  ;;  %v621_v50 = vrot.slane %v619_v34, 5  ;;  %v3206_v34 = vld [vmem:[%s3048_s19 + $0x7c] sm:$0xf] }
  0x3b   : > { %v691_v44 = vunpack.c.l.b16 %v516_v40  ;;  %2536 = vmatmul.msk.bf16.gmra.mxu1 %vm721_vm4, %v3161_v37  ;;  %v526_v49 = vsel %vm3075_vm3, %v521_v41, %v525_v16  ;;  %v315_v53 = vshll.u32 %v3159_v35, 16  ;;  %v321_v57 = vshll.u32 %v3166_v43, 16 }
  0x3c   : > { %v692_v54 = vunpack.c.l.b16 %v526_v49  ;;  %v607_v55 = vrot.slane %v606_v45, 4  ;;  %v616_v56 = vor.u32 %v615_v46, %v611_v42  ;;  %v314_v59 = vrot.slane %v312_v52, 4 }
  0x3d   : > { %v317_v60 = vrot.slane %v315_v53, 5  ;;  %v325_v63 = vshrl.u32 %v3166_v43, 16  ;;  %v331_v0 = vshll.u32 %v3169_v48, 16  ;;  %v323_v7 = vrot.slane %v321_v57, 5 }
  0x3e   : > { %v3186_v4 = vpack.c.b16 %v692_v54, %v691_v44  ;;  %v612_v5 = vsel %vm3075_vm3, %v607_v55, %v611_v42  ;;  %v617_v6 = vrot.slane %v616_v56, 4  ;;  %v432_v17 = vshrl.u32 %v3179_v58, 16 }
  0x3f   : > { %v699_v8 = vunpack.c.l.b16 %v612_v5  ;;  %v318_v9 = vor.u32 %v317_v60, %v314_v59  ;;  %v327_v13 = vrot.slane %v325_v63, 4  ;;  %v333_v14 = vrot.slane %v331_v0, 5 }
  0x40   : > { %2540 = vmatmul.msk.bf16.gmra.mxu2 %vm721_vm4, %v3186_v4  ;;  %v622_v16 = vsel %vm3075_vm3, %v617_v6, %v621_v50  ;;  %v435_v20 = vshll.u32 %v3179_v58, 16  ;;  %v441_v21 = vshll.u32 %v3184_v3, 16  ;;  %v445_v27 = vshrl.u32 %v3184_v3, 16  ;;  %v3213_v50 = vld [vmem:[%s3048_s19 + $0x80] sm:$0x1] }
  0x41   : > { %v700_v22 = vunpack.c.l.b16 %v622_v16  ;;  %v319_v25 = vrot.slane %v318_v9, 4  ;;  %v328_v26 = vor.u32 %v327_v13, %v323_v7  ;;  %v434_v30 = vrot.slane %v432_v17, 4  ;;  %v3232_v16 = vld [vmem:[%s3048_s19 + $0xac] sm:$0xf]  ;;  %v3235_v17 = vld [vmem:[%s3048_s19 + $0xb0] sm:$0x1] }
  0x42   : > { %v437_v31 = vrot.slane %v435_v20, 5  ;;  %v443_v32 = vrot.slane %v441_v21, 5  ;;  %v451_v33 = vshll.u32 %v3191_v15, 16  ;;  %v447_v44 = vrot.slane %v445_v27, 4  ;;  %4238 = vst [vmem:[#allocation9_spill] sm:$0xff] %v3232_v16 }
  0x43   : > { %v3208_v40 = vpack.c.b16 %v700_v22, %v699_v8  ;;  %v324_v41 = vsel %vm3075_vm3, %v319_v25, %v323_v7  ;;  %v329_v42 = vrot.slane %v328_v26, 4  ;;  %v528_v52 = vshrl.u32 %v3202_v28, 16  ;;  %v3225_v8 = vld [vmem:[%s3048_s19 + $0xa8] sm:$0xf]  ;;  %4239 = vst [vmem:[#allocation10_spill] sm:$0xff] %v3235_v17 }
  0x44   : > { %v675_v45 = vunpack.c.l.b16 %v324_v41  ;;  %v438_v46 = vor.u32 %v437_v31, %v434_v30  ;;  %v453_v49 = vrot.slane %v451_v33, 5  ;;  %v448_v54 = vor.u32 %v447_v44, %v443_v32  ;;  %4237 = vst [vmem:[#allocation8_spill] sm:$0xff] %v3225_v8 }
  0x45   : > { %4236 = vst [vmem:[#allocation7_spill] sm:$0xff] %v3208_v40  ;;  %2544 = vmatmul.msk.bf16.gmra.mxu3 %vm721_vm4, %v3208_v40  ;;  %v334_v53 = vsel %vm3075_vm3, %v329_v42, %v333_v14  ;;  %v531_v55 = vshll.u32 %v3202_v28, 16  ;;  %v537_v56 = vshll.u32 %v3206_v34, 16  ;;  %v530_v60 = vrot.slane %v528_v52, 4  ;;  %v3249_v52 = vld [vmem:[%s3048_s19 + $0x18] sm:$0xf] }
  0x46   : > { %v676_v57 = vunpack.c.l.b16 %v334_v53  ;;  %v439_v59 = vrot.slane %v438_v46, 4  ;;  %v541_v63 = vshrl.u32 %v3206_v34, 16  ;;  %v449_v0 = vrot.slane %v448_v54, 4  ;;  %v3335_v40 = vld [vmem:[%s3048_s19 + $0x24] sm:$0xf] }
  0x47   : > { %v533_v5 = vrot.slane %v531_v55, 5  ;;  %v539_v6 = vrot.slane %v537_v56, 5  ;;  %v547_v7 = vshll.u32 %v3213_v50, 16  ;;  %v624_v30 = vshrl.u32 %v3225_v8, 16  ;;  %v3254_v56 = vld [vmem:[%s3048_s19 + $0x1c] sm:$0xf] }
  0x48   : > { %v3227_v9 = vpack.c.b16 %v676_v57, %v675_v45  ;;  %v444_v13 = vsel %vm3075_vm3, %v439_v59, %v443_v32  ;;  %v543_v14 = vrot.slane %v541_v63, 4  ;;  %v454_v20 = vsel %vm3075_vm3, %v449_v0, %v453_v49  ;;  %v3257_v57 = vld [vmem:[%s3048_s19 + $0x20] sm:$0x1] }
  0x49   : > { %v685_v21 = vunpack.c.l.b16 %v444_v13  ;;  %v534_v22 = vor.u32 %v533_v5, %v530_v60  ;;  %v549_v25 = vrot.slane %v547_v7, 5  ;;  %v686_v26 = vunpack.c.l.b16 %v454_v20 }
  0x4a   : > { %2532 = vmatmul.msk.bf16.gmra.mxu0 %vm721_vm4, %v3227_v9  ;;  %v544_v27 = vor.u32 %v543_v14, %v539_v6  ;;  %v627_v31 = vshll.u32 %v3225_v8, 16  ;;  %v633_v33 = vshll.u32 %v3232_v16, 16  ;;  %v637_v41 = vshrl.u32 %v3232_v16, 16 }
  0x4b   : > { %v535_v32 = vrot.slane %v534_v22, 4  ;;  %v643_v42 = vshll.u32 %v3235_v17, 16  ;;  %v3246_v44 = vpack.c.b16 %v686_v26, %v685_v21  ;;  %v626_v46 = vrot.slane %v624_v30, 4  ;;  %v3269_v26 = vld [vmem:[%s3048_s19 + $0x54] sm:$0xf] }
  0x4c   : > { %v545_v45 = vrot.slane %v544_v27, 4  ;;  %v629_v49 = vrot.slane %v627_v31, 5  ;;  %v635_v54 = vrot.slane %v633_v33, 5  ;;  %v639_v55 = vrot.slane %v637_v41, 4  ;;  %v3313_v17 = vld [vmem:[%s3048_s19 + $0xb4] sm:$0xf] }
  0x4d   : > { %4240 = vst [vmem:[#allocation11_spill] sm:$0xff] %v3246_v44  ;;  %v540_v53 = vsel %vm3075_vm3, %v535_v32, %v539_v6  ;;  %2537 = vmatmul.msk.bf16.gmra.mxu1 %vm721_vm4, %v3246_v44  ;;  %v645_v0 = vrot.slane %v643_v42, 5  ;;  %v336_v6 = vshrl.u32 %v3249_v52, 16  ;;  %v339_v13 = vshll.u32 %v3249_v52, 16  ;;  %v3274_v32 = vld [vmem:[%s3048_s19 + $0x58] sm:$0xf] }
  0x4e   : > { %v550_v59 = vsel %vm3075_vm3, %v545_v45, %v549_v25  ;;  %v693_v60 = vunpack.c.l.b16 %v540_v53  ;;  %v630_v63 = vor.u32 %v629_v49, %v626_v46  ;;  %v640_v7 = vor.u32 %v639_v55, %v635_v54  ;;  %v3279_v46 = vld [vmem:[%s3048_s19 + $0x5c] sm:$0x1]  ;;  %4243 = vst [vmem:[#allocation14_spill] sm:$0xff] %v3313_v17 }
  0x4f   : > { %v694_v5 = vunpack.c.l.b16 %v550_v59  ;;  %v345_v20 = vshll.u32 %v3254_v56, 16  ;;  %v349_v21 = vshrl.u32 %v3254_v56, 16  ;;  %v355_v22 = vshll.u32 %v3257_v57, 16 }
  0x50   : > { %v631_v14 = vrot.slane %v630_v63, 4  ;;  %v641_v27 = vrot.slane %v640_v7, 4  ;;  %v338_v30 = vrot.slane %v336_v6, 4  ;;  %v341_v31 = vrot.slane %v339_v13, 5  ;;  %v3289_v7 = vld [vmem:[%s3048_s19 + $0x84] sm:$0xf] }
  0x51   : > { %v3271_v25 = vpack.c.b16 %v694_v5, %v693_v60  ;;  %v347_v41 = vrot.slane %v345_v20, 5  ;;  %v351_v42 = vrot.slane %v349_v21, 4  ;;  %v357_v45 = vrot.slane %v355_v22, 5  ;;  %4241 = vst [vmem:[#allocation12_spill] sm:$0xff] %v3289_v7 }
  0x52   : > { %v636_v33 = vsel %vm3075_vm3, %v631_v14, %v635_v54  ;;  %v646_v49 = vsel %vm3075_vm3, %v641_v27, %v645_v0  ;;  %v342_v55 = vor.u32 %v341_v31, %v338_v30  ;;  %v456_v59 = vshrl.u32 %v3269_v26, 16  ;;  %v3296_v30 = vld [vmem:[%s3048_s19 + $0x88] sm:$0xf] }
  0x53   : > { %2541 = vmatmul.msk.bf16.gmra.mxu2 %vm721_vm4, %v3271_v25  ;;  %v701_v53 = vunpack.c.l.b16 %v636_v33  ;;  %v702_v60 = vunpack.c.l.b16 %v646_v49  ;;  %v352_v63 = vor.u32 %v351_v42, %v347_v41  ;;  %v459_v54 = vshll.u32 %v3269_v26, 16  ;;  %v3301_v49 = vld [vmem:[%s3048_s19 + $0x8c] sm:$0x1] }
  0x54   : > { %v465_v5 = vshll.u32 %v3274_v32, 16  ;;  %v343_v6 = vrot.slane %v342_v55, 4  ;;  %v458_v13 = vrot.slane %v456_v59, 4  ;;  %v469_v14 = vshrl.u32 %v3274_v32, 16 }
  0x55   : > { %v475_v0 = vshll.u32 %v3279_v46, 16  ;;  %v3293_v20 = vpack.c.b16 %v702_v60, %v701_v53  ;;  %v353_v21 = vrot.slane %v352_v63, 4  ;;  %v461_v22 = vrot.slane %v459_v54, 5 }
  0x56   : > { %v467_v27 = vrot.slane %v465_v5, 5  ;;  %v348_v31 = vsel %vm3075_vm3, %v343_v6, %v347_v41  ;;  %v471_v33 = vrot.slane %v469_v14, 4  ;;  %v552_v55 = vshrl.u32 %v3289_v7, 16 }
  0x57   : > { %4242 = vst [vmem:[#allocation13_spill] sm:$0xff] %v3293_v20  ;;  %v477_v42 = vrot.slane %v475_v0, 5  ;;  %2545 = vmatmul.msk.bf16.gmra.mxu3 %vm721_vm4, %v3293_v20  ;;  %v358_v53 = vsel %vm3075_vm3, %v353_v21, %v357_v45  ;;  %v677_v59 = vunpack.c.l.b16 %v348_v31  ;;  %v462_v60 = vor.u32 %v461_v22, %v458_v13  ;;  %v3318_v22 = vld [vmem:[%s3048_s19 + $0xb8] sm:$0xf] }
  0x58   : > { %v555_v63 = vshll.u32 %v3289_v7, 16  ;;  %v678_v54 = vunpack.c.l.b16 %v358_v53  ;;  %v472_v41 = vor.u32 %v471_v33, %v467_v27  ;;  %v554_v5 = vrot.slane %v552_v55, 4  ;;  %4244 = vst [vmem:[#allocation15_spill] sm:$0xff] %v3318_v22 }
  0x59   : > { %v561_v6 = vshll.u32 %v3296_v30, 16  ;;  %v463_v14 = vrot.slane %v462_v60, 4  ;;  %v565_v8 = vshrl.u32 %v3296_v30, 16  ;;  %v571_v20 = vshll.u32 %v3301_v49, 16  ;;  %v3323_v60 = vld [vmem:[%s3048_s19 + $0xbc] sm:$0x1] }
  0x5a   : > { %v557_v0 = vrot.slane %v555_v63, 5  ;;  %v3315_v45 = vpack.c.b16 %v678_v54, %v677_v59  ;;  %v473_v21 = vrot.slane %v472_v41, 4  ;;  %4245 = vst [vmem:[#allocation16_spill] sm:$0xff] %v3323_v60  ;;  %v648_v54 = vshrl.u32 %v3313_v17, 16 }
  0x5b   : > { %v563_v13 = vrot.slane %v561_v6, 5  ;;  %v468_v31 = vsel %vm3075_vm3, %v463_v14, %v467_v27  ;;  %v567_v55 = vrot.slane %v565_v8, 4  ;;  %v573_v53 = vrot.slane %v571_v20, 5 }
  0x5c   : > { %v558_v33 = vor.u32 %v557_v0, %v554_v5  ;;  %2533 = vmatmul.msk.bf16.gmra.mxu0 %vm721_vm4, %v3315_v45  ;;  %v478_v59 = vsel %vm3075_vm3, %v473_v21, %v477_v42  ;;  %v687_v63 = vunpack.c.l.b16 %v468_v31  ;;  %v651_v41 = vshll.u32 %v3313_v17, 16 }
  0x5d   : > { %v688_v6 = vunpack.c.l.b16 %v478_v59  ;;  %v568_v5 = vor.u32 %v567_v55, %v563_v13  ;;  %v657_v8 = vshll.u32 %v3318_v22, 16  ;;  %v650_v20 = vrot.slane %v648_v54, 4 }
  0x5e   : > { %v559_v27 = vrot.slane %v558_v33, 4  ;;  %v653_v14 = vrot.slane %v651_v41, 5  ;;  %v661_v0 = vshrl.u32 %v3318_v22, 16  ;;  %v667_v16 = vshll.u32 %v3323_v60, 16  ;;  %v3342_v33 = vld [vmem:[%s3048_s19 + $0x28] sm:$0xf] }
  0x5f   : > { %v3337_v42 = vpack.c.b16 %v688_v6, %v687_v63  ;;  %v569_v31 = vrot.slane %v568_v5, 4  ;;  %v659_v59 = vrot.slane %v657_v8, 5  ;;  %v1107_v55 = vrot.slane %v3095_v2, 5 }
  0x60   : > { %v564_v21 = vsel %vm3075_vm3, %v559_v27, %v563_v13  ;;  %v654_v54 = vor.u32 %v653_v14, %v650_v20  ;;  %v663_v41 = vrot.slane %v661_v0, 4  ;;  %v669_v6 = vrot.slane %v667_v16, 5 }
  0x61   : > { %4246 = vst [vmem:[#allocation17_spill] sm:$0xff] %v3337_v42  ;;  %v695_v17 = vunpack.c.l.b16 %v564_v21  ;;  %2538 = vmatmul.msk.bf16.gmra.mxu1 %vm721_vm4, %v3337_v42  ;;  %v574_v63 = vsel %vm3075_vm3, %v569_v31, %v573_v53  ;;  %v360_v13 = vshrl.u32 %v3335_v40, 16  ;;  %v363_v27 = vshll.u32 %v3335_v40, 16 }
  0x62   : > { %v696_v5 = vunpack.c.l.b16 %v574_v63  ;;  %v655_v8 = vrot.slane %v654_v54, 4  ;;  %v664_v60 = vor.u32 %v663_v41, %v659_v59  ;;  %v369_v2 = vshll.u32 %v3342_v33, 16  ;;  %v2716_v54 = vld [vmem:[%s4187_s1 + $0xc] sm:$0x3]  ;;  %v2737_v41 = vld [vmem:[%s4187_s1 + $0xe] sm:$0x3] }
  0x63   : > { %v362_v20 = vrot.slane %v360_v13, 4  ;;  %v365_v14 = vrot.slane %v363_v27, 5  ;;  %v373_v0 = vshrl.u32 %v3342_v33, 16  ;;  %v379_v21 = vshll.u32 %v3346_v39, 16 }
  0x64   : > { %v3357_v22 = vpack.c.b16 %v696_v5, %v695_v17  ;;  %v660_v16 = vsel %vm3075_vm3, %v655_v8, %v659_v59  ;;  %v665_v53 = vrot.slane %v664_v60, 4  ;;  %v371_v31 = vrot.slane %v369_v2, 5  ;;  %v2699_v17 = vld [vmem:[%s4187_s1 + $0xa] sm:$0x3]  ;;  %v2755_v60 = vld [vmem:[%s4187_s1 + $0x10] sm:$0x3] }
  0x65   : > { %v703_v63 = vunpack.c.l.b16 %v660_v16  ;;  %v366_v13 = vor.u32 %v365_v14, %v362_v20  ;;  %v375_v27 = vrot.slane %v373_v0, 4  ;;  %v381_v7 = vrot.slane %v379_v21, 5 }
  0x66   : > { %4247 = vst [vmem:[#allocation18_spill] sm:$0xff] %v3357_v22  ;;  %2542 = vmatmul.msk.bf16.gmra.mxu2 %vm721_vm4, %v3357_v22  ;;  %v670_v59 = vsel %vm3075_vm3, %v665_v53, %v669_v6  ;;  %v2627_v5 = vrot.slane %v3085_v61, 9  ;;  %v1104_v0 = vrot.slane %v3092_v1, 5  ;;  %v1877_v21 = vsel %vm770_vm0, %v2716_v54, 0 }
  0x67   : > { %v704_v8 = vunpack.c.l.b16 %v670_v59  ;;  %v367_v2 = vrot.slane %v366_v13, 4  ;;  %v376_v20 = vor.u32 %v375_v27, %v371_v31  ;;  %v2033_v16 = vsel %vm770_vm0, %v2737_v41, 0  ;;  %1886 = vmatpush.bf16.msra.mxu2 %v1877_v21  ;;  %v2778_v21 = vld [vmem:[%s3048_s19 + $0xc] sm:$0xff] }
  0x68   : > { %v1743_v22 = vsel %vm770_vm0, %v2699_v17, 0  ;;  %v2173_v6 = vsel %vm770_vm0, %v2755_v60, 0  ;;  %v1105_v27 = vsel %vm3378_vm7, %v2627_v5, %v1104_v0  ;;  %2042 = vmatpush.bf16.msra.mxu3 %v2033_v16  ;;  %v1106_v54 = vrot.slane %v1104_v0, 4 }
  0x69   : > { %v3387_v53 = vpack.c.b16 %v704_v8, %v703_v63  ;;  %v372_v61 = vsel %vm3075_vm3, %v367_v2, %v371_v31  ;;  %v377_v13 = vrot.slane %v376_v20, 4  ;;  %1752 = vmatpush.bf16.msra.mxu1 %v1743_v22  ;;  %2182 = vmatpush.bf16.msra.mxu0 %v2173_v6  ;;  %v2628_v41 = vrot.slane %v3159_v35, 9  ;;  %v2777_v22 = vld [vmem:[%s3048_s19] sm:$0xff]  ;;  %v3424_v6 = vld [vmem:[%s3048_s19 + $0x18] sm:$0xff] }
  0x6a   : > { %v679_v1 = vunpack.c.l.b16 %v372_v61  ;;  %v1216_v31 = vunpack.c.l.b16 %v1105_v27  ;;  %v1111_v17 = vrot.slane %v3166_v43, 5  ;;  %v1114_v60 = vrot.slane %v3169_v48, 5 }
  0x6b   : > { %2546 = vmatmul.msk.bf16.gmra.mxu3 %vm721_vm4, %v3387_v53  ;;  %v382_v63 = vsel %vm3075_vm3, %v377_v13, %v381_v7  ;;  %v1108_v5 = vsel %vm3378_vm7, %v1106_v54, %v1107_v55  ;;  %v1118_v16 = vrot.slane %v3254_v56, 5  ;;  %v2629_v61 = vrot.slane %v3249_v52, 9 }
  0x6c   : > { %v680_v59 = vunpack.c.l.b16 %v382_v63  ;;  %v1217_v8 = vunpack.c.l.b16 %v1108_v5  ;;  %v1112_v35 = vsel %vm3378_vm7, %v2628_v41, %v1111_v17  ;;  %v1113_v2 = vrot.slane %v1111_v17, 4  ;;  %v3444_v41 = vld [vmem:[%s3048_s19 + $0x24] sm:$0xff] }
  0x6d   : > { %v1218_v7 = vunpack.c.l.b16 %v1112_v35  ;;  %v1120_v13 = vrot.slane %v1118_v16, 4  ;;  %v1121_v27 = vrot.slane %v3257_v57, 5  ;;  %v1125_v57 = vrot.slane %v3342_v33, 5 }
  0x6e   : > { %v3405_v20 = vpack.c.b16 %v680_v59, %v679_v1  ;;  %v1248_v0 = vpack.c.b16 %v1217_v8, %v1216_v31  ;;  %v1115_v43 = vsel %vm3378_vm7, %v1113_v2, %v1114_v60  ;;  %v2630_v63 = vrot.slane %v3335_v40, 9  ;;  %v3466_v8 = vld [vmem:[%s3048_s19 + $0x30] sm:$0xff] }
  0x6f   : > { %v1219_v48 = vunpack.c.l.b16 %v1115_v43  ;;  %v1122_v56 = vsel %vm3378_vm7, %v1120_v13, %v1121_v27  ;;  %v1127_v31 = vrot.slane %v1125_v57, 4  ;;  %v1128_v17 = vrot.slane %v3346_v39, 5  ;;  %v3494_v27 = vld [vmem:[%s3048_s19 + $0x3c] sm:$0xff] }
  0x70   : > { %2534 = vmatmul.msk.bf16.gmra.mxu0 %vm721_vm4, %v3405_v20  ;;  %v1221_v54 = vunpack.c.l.b16 %v1122_v56  ;;  %v1126_v60 = vsel %vm3378_vm7, %v2630_v63, %v1125_v57  ;;  %v1132_v39 = vrot.slane %v3054_v11, 5  ;;  %v2631_v35 = vrot.slane %v3051_v10, 9 }
  0x71   : > { %2611 = vmatmul.msk.bf16.vlgmr.msrb.gmra.mxu1 %vm721_vm4, %v2777_v22  ;;  %v3412_v55 = vpack.c.b16 %v1219_v48, %v1218_v7  ;;  %v1129_v33 = vsel %vm3378_vm7, %v1127_v31, %v1128_v17  ;;  %v1222_v59 = vunpack.c.l.b16 %v1126_v60  ;;  %v1135_v7 = vrot.slane %v3057_v12, 5 }
  0x72   : > { %v1223_v5 = vunpack.c.l.b16 %v1129_v33  ;;  %v1134_v2 = vrot.slane %v1132_v39, 4  ;;  %v1139_v13 = vrot.slane %v3114_v24, 5  ;;  %v2632_v56 = vrot.slane %v3111_v23, 9 }
  0x74   : > { %v3458_v40 = vpack.c.b16 %v1223_v5, %v1222_v59  ;;  %v1136_v11 = vsel %vm3378_vm7, %v1134_v2, %v1135_v7  ;;  %v1140_v24 = vsel %vm3378_vm7, %v2632_v56, %v1139_v13  ;;  %v1146_v5 = vrot.slane %v3184_v3, 5 }
  0x75   : > { %v1226_v23 = vunpack.c.l.b16 %v1140_v24  ;;  %v2633_v7 = vrot.slane %v3179_v58, 9  ;;  %v1153_v24 = vrot.slane %v3274_v32, 5 }
  0x76   : > { %2644 = vmatmul.msk.bf16.vlgmr.msrb.gmra.mxu2 %vm721_vm4, %v1248_v0  ;;  %v1133_v0 = vsel %vm3378_vm7, %v2631_v35, %v1132_v39  ;;  %v3528_v35 = vld [vmem:[%s3048_s19 + $0x48] sm:$0xff] }
  0x77   : > { %v1224_v48 = vunpack.c.l.b16 %v1133_v0  ;;  %4252 = vst [vmem:[#allocation21_spill] sm:$0xff] %v3528_v35  ;;  %v1148_v0 = vrot.slane %v1146_v5, 4 }
  0x7b   : > { %2665 = vmatmul.msk.bf16.vlgmr.msrb.gmra.mxu3 %vm721_vm4, %v2778_v21 }
  0x80   : > { %2682 = vmatmul.msk.bf16.vlgmr.msrb.gmra.mxu0 %vm721_vm4, %v3227_v9  ;;  %v1119_v9 = vsel %vm3378_vm7, %v2629_v61, %v1118_v16 }
  0x81   : > { %2612 = vmatmul.msk.bf16.gmra.mxu1 %vm721_vm4, %v2778_v21  ;;  %v1220_v1 = vunpack.c.l.b16 %v1119_v9  ;;  %v1225_v21 = vunpack.c.l.b16 %v1136_v11  ;;  %v1149_v11 = vrot.slane %v3191_v15, 5 }
  0x83   : > { %v3438_v52 = vpack.c.b16 %v1221_v54, %v1220_v1  ;;  %v3486_v12 = vpack.c.b16 %v1225_v21, %v1224_v48  ;;  %v1141_v1 = vrot.slane %v1139_v13, 4  ;;  %v1142_v54 = vrot.slane %v3119_v29, 5 }
  0x84   : > { %v1147_v21 = vsel %vm3378_vm7, %v2633_v7, %v1146_v5  ;;  %v1150_v13 = vsel %vm3378_vm7, %v1148_v0, %v1149_v11  ;;  %v2634_v5 = vrot.slane %v3269_v26, 9  ;;  %v1155_v7 = vrot.slane %v1153_v24, 4 }
  0x85   : > { %v1143_v63 = vsel %vm3378_vm7, %v1141_v1, %v1142_v54  ;;  %v1228_v56 = vunpack.c.l.b16 %v1147_v21  ;;  %v1229_v1 = vunpack.c.l.b16 %v1150_v13  ;;  %v1156_v0 = vrot.slane %v3279_v46, 5 }
  0x86   : > { %2645 = vmatmul.msk.bf16.gmra.mxu2 %vm721_vm4, %v3412_v55  ;;  %v1227_v60 = vunpack.c.l.b16 %v1143_v63  ;;  %v1154_v32 = vsel %vm3378_vm7, %v2634_v5, %v1153_v24  ;;  %v1160_v5 = vrot.slane %v3066_v19, 5 }
  0x87   : > { %v3552_v54 = vpack.c.b16 %v1229_v1, %v1228_v56  ;;  %v1157_v13 = vsel %vm3378_vm7, %v1155_v7, %v1156_v0  ;;  %v1230_v56 = vunpack.c.l.b16 %v1154_v32  ;;  %v2858_v32 = vld [vmem:[%s3048_s19 + $0x68] sm:$0x1] }
  0x88   : > { %v3518_v33 = vpack.c.b16 %v1227_v60, %v1226_v23  ;;  %v3562_v60 = vld [vmem:[%s3048_s19 + $0x54] sm:$0xff]  ;;  %v1231_v46 = vunpack.c.l.b16 %v1157_v13  ;;  %v1163_v13 = vrot.slane %v2858_v32, 5 }
  0x89   : > { %4255 = vst [vmem:[#allocation24_spill] sm:$0xff] %v3552_v54 }
  0x8a   : > { %4256 = vst [vmem:[#allocation25_spill] sm:$0xff] %v3562_v60 }
  0x8b   : > { %2666 = vmatmul.msk.bf16.gmra.mxu3 %vm721_vm4, %v3424_v6 }
  0x90   : > { %2683 = vmatmul.msk.bf16.gmra.mxu0 %vm721_vm4, %v3315_v45 }
  0x91   : > { %2613 = vmatmul.msk.bf16.gmra.mxu1 %vm721_vm4, %v3424_v6 }
  0x96   : > { %2646 = vmatmul.msk.bf16.gmra.mxu2 %vm721_vm4, %v3438_v52 }
  0x9b   : > { %2667 = vmatmul.msk.bf16.gmra.mxu3 %vm721_vm4, %v3444_v41 }
  0xa0   : > { %2684 = vmatmul.msk.bf16.gmra.mxu0 %vm721_vm4, %v3405_v20 }
  0xa1   : > { %2614 = vmatmul.msk.bf16.gmra.mxu1 %vm721_vm4, %v3444_v41 }
  0xa6   : > { %v3461_v22 = vpop.f32.mrf.mxu1  ;;  %2647 = vmatmul.msk.bf16.gmra.mxu2 %vm721_vm4, %v3458_v40 }
  0xab   : > { %2668 = vmatmul.msk.bf16.gmra.mxu3 %vm721_vm4, %v3466_v8 }
  0xae   : > { %v3476_v43 = vpop.f32.mrf.mxu1 }
  0xb0   : > { %v3478_v16 = vpop.f32.mrf.mxu2  ;;  %2685 = vmatmul.msk.bf16.gmra.mxu0 %vm721_vm4, %v3087_v62 }
  0xb1   : > { %2615 = vmatmul.msk.bf16.gmra.mxu1 %vm721_vm4, %v3466_v8 }
  0xb3   : > { %v3484_v10 = vpop.f32.mrf.mxu0 }
  0xb4   : > { %v3488_v61 = vpop.f32.mrf.mxu3 }
  0xb5   : > { %4250 = vst [vmem:[#allocation19_spill] sm:$0xff] %v3488_v61 }
  0xb6   : > { %2648 = vmatmul.msk.bf16.gmra.mxu2 %vm721_vm4, %v3486_v12 }
  0xb8   : > { %v3496_v9 = vpop.f32.mrf.mxu1  ;;  %v3500_v57 = vpop.f32.mrf.mxu2 }
  0xbb   : > { %2669 = vmatmul.msk.bf16.gmra.mxu3 %vm721_vm4, %v3494_v27  ;;  %v3508_v31 = vpop.f32.mrf.mxu0 }
  0xbc   : > { %v3510_v17 = vpop.f32.mrf.mxu3 }
  0xbd   : > { %4251 = vst [vmem:[#allocation20_spill] sm:$0xff] %v3510_v17 }
  0xc0   : > { %2686 = vmatmul.msk.bf16.gmra.mxu0 %vm721_vm4, %v3161_v37  ;;  %v3514_v29 = vpop.f32.mrf.mxu1 }
  0xc1   : > { %2616 = vmatmul.msk.bf16.gmra.mxu1 %vm721_vm4, %v3494_v27 }
  0xc3   : > { %v3520_v59 = vpop.f32.mrf.mxu2 }
  0xc6   : > { %2649 = vmatmul.msk.bf16.gmra.mxu2 %vm721_vm4, %v3518_v33 }
  0xc7   : > { %v3523_v39 = vpop.f32.mrf.mxu0 }
  0xc8   : > { %v3530_v2 = vpop.f32.mrf.mxu3 }
  0xc9   : > { %4253 = vst [vmem:[#allocation22_spill] sm:$0xff] %v3530_v2 }
  0xca   : > { %v3534_v48 = vpop.f32.mrf.mxu1 }
  0xcb   : > { %2670 = vmatmul.msk.bf16.gmra.mxu3 %vm721_vm4, %v3528_v35  ;;  %v3538_v3 = vpop.f32.mrf.mxu2 }
  0xcf   : > { %v3544_v58 = vpop.f32.mrf.mxu0 }
  0xd0   : > { %2687 = vmatmul.msk.bf16.gmra.mxu0 %vm721_vm4, %v3246_v44  ;;  %v3548_v15 = vpop.f32.mrf.mxu3 }
  0xd1   : > { %4254 = vst [vmem:[#allocation23_spill] sm:$0xff] %v3548_v15  ;;  %2617 = vmatmul.msk.bf16.gmra.mxu1 %vm721_vm4, %v3528_v35  ;;  %v3597_v15 = vld [vmem:[%s3048_s19 + $0x60] sm:$0xff] }
  0xd2   : > { %v3555_v63 = vpop.f32.mrf.mxu1  ;;  %4260 = vst [vmem:[#allocation29_spill] sm:$0xff] %v3597_v15 }
  0xd6   : > { %v3557_v23 = vpop.f32.mrf.mxu2  ;;  %2650 = vmatmul.msk.bf16.gmra.mxu2 %vm721_vm4, %v3552_v54 }
  0xd9   : > { %v3566_v11 = vpop.f32.mrf.mxu0 }
  0xda   : > { %v3568_v21 = vpop.f32.mrf.mxu3 }
  0xdb   : > { %4257 = vst [vmem:[#allocation26_spill] sm:$0xff] %v3568_v21  ;;  %2671 = vmatmul.msk.bf16.gmra.mxu3 %vm721_vm4, %v3562_v60  ;;  %v3584_v21 = vpack.c.b16 %v1231_v46, %v1230_v56 }
  0xdd   : > { %4258 = vst [vmem:[#allocation27_spill] sm:$0xff] %v3584_v21 }
  0xde   : > { %v3576_v26 = vpop.f32.mrf.mxu1  ;;  %v3578_v1 = vpop.f32.mrf.mxu2 }
  0xe0   : > { %2688 = vmatmul.msk.bf16.gmra.mxu0 %vm721_vm4, %v3337_v42  ;;  %v2859_v42 = vld [vmem:[%s3048_s19 + $0x60] sm:$0xf] }
  0xe1   : > { %2618 = vmatmul.msk.bf16.gmra.mxu1 %vm721_vm4, %v3562_v60  ;;  %v3586_v24 = vpop.f32.mrf.mxu0  ;;  %v2635_v2 = vrot.slane %v2859_v42, 9  ;;  %v1162_v60 = vrot.slane %v1160_v5, 4 }
  0xe2   : > { %v3589_v7 = vpop.f32.mrf.mxu3 }
  0xe3   : > { %4259 = vst [vmem:[#allocation28_spill] sm:$0xff] %v3589_v7  ;;  %v1161_v19 = vsel %vm3378_vm7, %v2635_v2, %v1160_v5  ;;  %v1164_v46 = vsel %vm3378_vm7, %v1162_v60, %v1163_v13  ;;  %v1167_v60 = vrot.slane %v3134_v47, 5 }
  0xe4   : > { %v1232_v17 = vunpack.c.l.b16 %v1161_v19  ;;  %v1233_v42 = vunpack.c.l.b16 %v1164_v46  ;;  %v3630_v19 = vld [vmem:[%s3048_s19 + $0x6c] sm:$0xff] }
  0xe6   : > { %2651 = vmatmul.msk.bf16.gmra.mxu2 %vm721_vm4, %v3584_v21  ;;  %v3593_v0 = vpop.f32.mrf.mxu1  ;;  %v3619_v2 = vpack.c.b16 %v1233_v42, %v1232_v17  ;;  %v1169_v17 = vrot.slane %v1167_v60, 4 }
  0xe8   : > { %4262 = vst [vmem:[#allocation31_spill] sm:$0xff] %v3619_v2 }
  0xe9   : > { %v3600_v56 = vpop.f32.mrf.mxu2 }
  0xeb   : > { %2672 = vmatmul.msk.bf16.gmra.mxu3 %vm721_vm4, %v3597_v15 }
  0xed   : > { %v3608_v7 = vpop.f32.mrf.mxu0 }
  0xee   : > { %v3610_v32 = vpop.f32.mrf.mxu3  ;;  %v1003_v21 = vpop.f32.mrf.mxu1 }
  0xef   : > { %4261 = vst [vmem:[#allocation30_spill] sm:$0xff] %v3610_v32  ;;  %v1004_v54 = vadd.f32 %v1003_v21, %v3484_v10  ;;  %v1170_v21 = vrot.slane %v3141_v51, 5  ;;  %v2636_v32 = vrot.slane %v3127_v38, 9 }
  0xf0   : > { %2689 = vmatmul.msk.bf16.gmra.mxu0 %vm721_vm4, %v3106_v18 }
  0xf1   : > { %v3615_v44 = vpop.f32.mrf.mxu2  ;;  %2619 = vmatmul.msk.bf16.gmra.mxu1 %vm721_vm4, %v3597_v15  ;;  %v1168_v47 = vsel %vm3378_vm7, %v2636_v32, %v1167_v60 }
  0xf2   : > { %v1234_v61 = vunpack.c.l.b16 %v1168_v47 }
  0xf5   : > { %v3622_v5 = vpop.f32.mrf.mxu0 }
  0xf6   : > { %v3624_v13 = vpop.f32.mrf.mxu3  ;;  %2652 = vmatmul.msk.bf16.gmra.mxu2 %vm721_vm4, %v3619_v2  ;;  %v1005_v10 = vpop.f32.mrf.mxu1 }
  0xf7   : > { %4263 = vst [vmem:[#allocation32_spill] sm:$0xff] %v3624_v13  ;;  %v1006_v46 = vadd.f32 %v1005_v10, %v3508_v31  ;;  %v1171_v13 = vsel %vm3378_vm7, %v1169_v17, %v1170_v21  ;;  %v1174_v21 = vrot.slane %v3206_v34, 5 }
  0xf8   : > { %v1235_v35 = vunpack.c.l.b16 %v1171_v13  ;;  %v1177_v13 = vrot.slane %v3213_v50, 5 }
  0xf9   : > { %v1324_v42 = vpop.f32.mrf.mxu2 }
  0xfa   : > { %v1404_v18 = vadd.f32 %v1324_v42, %v1004_v54  ;;  %v3647_v10 = vpack.c.b16 %v1235_v35, %v1234_v61  ;;  %v3654_v42 = vld [vmem:[%s3048_s19 + $0x78] sm:$0xff] }
  0xfb   : > { %2673 = vmatmul.msk.bf16.gmra.mxu3 %vm721_vm4, %v3630_v19 }
  0xfd   : > { %v1614_v2 = vpop.f32.mrf.mxu0 }
  0xfe   : > { %v1458_v51 = vpop.f32.mrf.mxu3  ;;  %v1008_v15 = vpop.f32.mrf.mxu1 }
  0xff   : > { %v1538_v31 = vadd.f32 %v1458_v51, %v1404_v18  ;;  %v1009_v38 = vadd.f32 %v1008_v15, %v3523_v39 }
 0x100   : > { %2690 = vmatmul.msk.bf16.gmra.mxu0 %vm721_vm4, %v3186_v4 }
 0x101   : > { %v1326_v54 = vpop.f32.mrf.mxu2  ;;  %2620 = vmatmul.msk.bf16.gmra.mxu1 %vm721_vm4, %v3630_v19  ;;  %v3645_v32 = vadd.f32 %v1614_v2, %v1538_v31  ;;  %v2637_v2 = vrot.slane %v3202_v28, 9 }
 0x102   : > { %v1405_v60 = vadd.f32 %v1326_v54, %v1006_v46  ;;  %v1176_v46 = vrot.slane %v1174_v21, 4 }
 0x103   : > { %v1175_v50 = vsel %vm3378_vm7, %v2637_v2, %v1174_v21 }
 0x104   : > { %v1178_v51 = vsel %vm3378_vm7, %v1176_v46, %v1177_v13  ;;  %v1184_v46 = vrot.slane %v3301_v49, 5 }
 0x105   : > { %v1616_v17 = vpop.f32.mrf.mxu0 }
 0x106   : > { %v1460_v18 = vpop.f32.mrf.mxu3  ;;  %2653 = vmatmul.msk.bf16.gmra.mxu2 %vm721_vm4, %v3647_v10  ;;  %v1010_v39 = vpop.f32.mrf.mxu1 }
 0x107   : > { %v1539_v15 = vadd.f32 %v1460_v18, %v1405_v60  ;;  %v1011_v47 = vadd.f32 %v1010_v39, %v3544_v58  ;;  %v1236_v58 = vunpack.c.l.b16 %v1175_v50  ;;  %v1237_v18 = vunpack.c.l.b16 %v1178_v51  ;;  %v3680_v50 = vld [vmem:[%s3048_s19 + $0x84] sm:$0xff] }
 0x109   : > { %v1329_v61 = vpop.f32.mrf.mxu2  ;;  %v3658_v35 = vadd.f32 %v1616_v17, %v1539_v15  ;;  %v3673_v13 = vpack.c.b16 %v1237_v18, %v1236_v58  ;;  %v1181_v15 = vrot.slane %v3296_v30, 5 }
 0x10a   : > { %v1406_v34 = vadd.f32 %v1329_v61, %v1009_v38 }
 0x10b   : > { %2674 = vmatmul.msk.bf16.gmra.mxu3 %vm721_vm4, %v3654_v42 }
 0x10d   : > { %v1619_v31 = vpop.f32.mrf.mxu0 }
 0x10e   : > { %v1463_v54 = vpop.f32.mrf.mxu3  ;;  %v1013_v60 = vpop.f32.mrf.mxu1 }
 0x10f   : > { %v1540_v28 = vadd.f32 %v1463_v54, %v1406_v34  ;;  %v1014_v17 = vadd.f32 %v1013_v60, %v3566_v11 }
 0x110   : > { %2691 = vmatmul.msk.bf16.gmra.mxu0 %vm721_vm4, %v3271_v25 }
 0x111   : > { %v1331_v38 = vpop.f32.mrf.mxu2  ;;  %2621 = vmatmul.msk.bf16.gmra.mxu1 %vm721_vm4, %v3654_v42  ;;  %v3671_v21 = vadd.f32 %v1619_v31, %v1540_v28  ;;  %v4264_v31 = vld [vmem:[#allocation12_spill] sm:$0xff] }
 0x112   : > { %v1407_v39 = vadd.f32 %v1331_v38, %v1011_v47  ;;  %v2638_v54 = vrot.slane %v4264_v31, 9  ;;  %v1183_v47 = vrot.slane %v1181_v15, 4 }
 0x114   : > { %v1182_v49 = vsel %vm3378_vm7, %v2638_v54, %v1181_v15  ;;  %v1185_v18 = vsel %vm3378_vm7, %v1183_v47, %v1184_v46  ;;  %v2860_v54 = vld [vmem:[%s3048_s19 + $0x94] sm:$0xf] }
 0x115   : > { %v1621_v2 = vpop.f32.mrf.mxu0  ;;  %v1188_v47 = vrot.slane %v2860_v54, 5 }
 0x116   : > { %v1465_v61 = vpop.f32.mrf.mxu3  ;;  %2654 = vmatmul.msk.bf16.gmra.mxu2 %vm721_vm4, %v3673_v13  ;;  %v1015_v11 = vpop.f32.mrf.mxu1 }
 0x117   : > { %v1541_v34 = vadd.f32 %v1465_v61, %v1407_v39  ;;  %v1016_v51 = vadd.f32 %v1015_v11, %v3586_v24  ;;  %v1238_v39 = vunpack.c.l.b16 %v1182_v49  ;;  %v1239_v61 = vunpack.c.l.b16 %v1185_v18 }
 0x119   : > { %v1334_v60 = vpop.f32.mrf.mxu2  ;;  %v3684_v58 = vadd.f32 %v1621_v2, %v1541_v34  ;;  %v3699_v31 = vpack.c.b16 %v1239_v61, %v1238_v39 }
 0x11a   : > { %v1408_v30 = vadd.f32 %v1334_v60, %v1014_v17  ;;  %v4266_v17 = vld [vmem:[#allocation18_spill] sm:$0xff] }
 0x11b   : > { %4265 = vst [vmem:[#allocation12_spill] sm:$0xff] %v3684_v58  ;;  %2675 = vmatmul.msk.bf16.gmra.mxu3 %vm721_vm4, %v3680_v50 }
 0x11c   : > { %4268 = vst [vmem:[#allocation34_spill] sm:$0xff] %v3699_v31 }
 0x11d   : > { %v1624_v28 = vpop.f32.mrf.mxu0 }
 0x11e   : > { %v1468_v24 = vpop.f32.mrf.mxu3  ;;  %v1018_v38 = vpop.f32.mrf.mxu1 }
 0x11f   : > { %v1542_v11 = vadd.f32 %v1468_v24, %v1408_v30  ;;  %v1019_v2 = vadd.f32 %v1018_v38, %v3608_v7  ;;  %v2861_v30 = vld [vmem:[%s3048_s19 + $0x98] sm:$0x1]  ;;  %v3706_v38 = vld [vmem:[%s3048_s19 + $0x90] sm:$0xff] }
 0x120   : > { %2692 = vmatmul.msk.bf16.gmra.mxu0 %vm721_vm4, %v4266_v17  ;;  %v1191_v49 = vrot.slane %v2861_v30, 5  ;;  %4269 = vst [vmem:[#allocation35_spill] sm:$0xff] %v3706_v38 }
 0x121   : > { %v1336_v34 = vpop.f32.mrf.mxu2  ;;  %2622 = vmatmul.msk.bf16.gmra.mxu1 %vm721_vm4, %v3680_v50  ;;  %v3697_v15 = vadd.f32 %v1624_v28, %v1542_v11  ;;  %v2862_v28 = vld [vmem:[%s3048_s19 + $0x90] sm:$0xf] }
 0x122   : > { %v1409_v46 = vadd.f32 %v1336_v34, %v1016_v51  ;;  %v2639_v11 = vrot.slane %v2862_v28, 9  ;;  %v1190_v51 = vrot.slane %v1188_v47, 4 }
 0x123   : > { %4267 = vst [vmem:[#allocation33_spill] sm:$0xff] %v3697_v15 }
 0x124   : > { %v1189_v54 = vsel %vm3378_vm7, %v2639_v11, %v1188_v47  ;;  %v2863_v11 = vld [vmem:[%s3048_s19 + $0xa0] sm:$0xf] }
 0x125   : > { %v1626_v60 = vpop.f32.mrf.mxu0 }
 0x126   : > { %v1470_v7 = vpop.f32.mrf.mxu3  ;;  %2655 = vmatmul.msk.bf16.gmra.mxu2 %vm721_vm4, %v3699_v31  ;;  %v1020_v18 = vpop.f32.mrf.mxu1  ;;  %v2865_v31 = vld [vmem:[%s3048_s19 + $0x9c] sm:$0xf] }
 0x127   : > { %v1543_v24 = vadd.f32 %v1470_v7, %v1409_v46  ;;  %v1021_v58 = vadd.f32 %v1020_v18, %v3622_v5  ;;  %v1192_v46 = vsel %vm3378_vm7, %v1190_v51, %v1191_v49  ;;  %v1240_v18 = vunpack.c.l.b16 %v1189_v54 }
 0x128   : > { %v1241_v28 = vunpack.c.l.b16 %v1192_v46  ;;  %v1195_v51 = vrot.slane %v2863_v11, 5  ;;  %v2864_v46 = vld [vmem:[%s3048_s19 + $0xa4] sm:$0x1] }
 0x129   : > { %v1339_v39 = vpop.f32.mrf.mxu2  ;;  %v3710_v61 = vadd.f32 %v1626_v60, %v1543_v24  ;;  %v4271_v60 = vld [vmem:[#allocation6_spill] sm:$0xff] }
 0x12a   : > { %v1410_v34 = vadd.f32 %v1339_v39, %v1019_v2  ;;  %v3724_v49 = vpack.c.b16 %v1241_v28, %v1240_v18 }
 0x12b   : > { %4270 = vst [vmem:[#allocation36_spill] sm:$0xff] %v3710_v61  ;;  %2676 = vmatmul.msk.bf16.gmra.mxu3 %vm721_vm4, %v3706_v38 }
 0x12c   : > { %4273 = vst [vmem:[#allocation38_spill] sm:$0xff] %v3724_v49 }
 0x12d   : > { %v1629_v30 = vpop.f32.mrf.mxu0 }
 0x12e   : > { %v1473_v7 = vpop.f32.mrf.mxu3  ;;  %v1023_v5 = vpop.f32.mrf.mxu1 }
 0x12f   : > { %v1544_v15 = vadd.f32 %v1473_v7, %v1410_v34  ;;  %v1198_v7 = vrot.slane %v2864_v46, 5 }
 0x130   : > { %2693 = vmatmul.msk.bf16.gmra.mxu0 %vm721_vm4, %v4271_v60  ;;  %v3731_v60 = vld [vmem:[%s3048_s19 + $0x9c] sm:$0xff] }
 0x131   : > { %v1341_v2 = vpop.f32.mrf.mxu2  ;;  %2623 = vmatmul.msk.bf16.gmra.mxu1 %vm721_vm4, %v3706_v38  ;;  %v3722_v47 = vadd.f32 %v1629_v30, %v1544_v15  ;;  %4274 = vst [vmem:[#allocation39_spill] sm:$0xff] %v3731_v60  ;;  %v2640_v38 = vrot.slane %v2865_v31, 9  ;;  %v1197_v15 = vrot.slane %v1195_v51, 4 }
 0x132   : > { %v1411_v24 = vadd.f32 %v1341_v2, %v1021_v58  ;;  %v1024_v58 = vadd.f32 %v1023_v5, %v3461_v22  ;;  %v4276_v5 = vld [vmem:[#allocation7_spill] sm:$0xff] }
 0x133   : > { %4272 = vst [vmem:[#allocation37_spill] sm:$0xff] %v3722_v47  ;;  %v1196_v2 = vsel %vm3378_vm7, %v2640_v38, %v1195_v51 }
 0x134   : > { %v1242_v31 = vunpack.c.l.b16 %v1196_v2 }
 0x135   : > { %v1631_v39 = vpop.f32.mrf.mxu0 }
 0x136   : > { %v1475_v54 = vpop.f32.mrf.mxu3  ;;  %2656 = vmatmul.msk.bf16.gmra.mxu2 %vm721_vm4, %v3724_v49  ;;  %v1025_v34 = vpop.f32.mrf.mxu1 }
 0x137   : > { %v1545_v61 = vadd.f32 %v1475_v54, %v1411_v24  ;;  %v1199_v24 = vsel %vm3378_vm7, %v1197_v15, %v1198_v7  ;;  %v4279_v15 = vld [vmem:[#allocation9_spill] sm:$0xff] }
 0x138   : > { %v1243_v47 = vunpack.c.l.b16 %v1199_v24  ;;  %v4280_v24 = vld [vmem:[#allocation10_spill] sm:$0xff] }
 0x139   : > { %v1344_v30 = vpop.f32.mrf.mxu2  ;;  %v3735_v18 = vadd.f32 %v1631_v39, %v1545_v61  ;;  %v1026_v61 = vadd.f32 %v1025_v34, %v3476_v43  ;;  %v3757_v34 = vld [vmem:[%s3048_s19 + $0xa8] sm:$0xff] }
 0x13a   : > { %v1412_v28 = vadd.f32 %v1344_v30, %v1024_v58  ;;  %v3750_v7 = vpack.c.b16 %v1243_v47, %v1242_v31  ;;  %v1202_v58 = vrot.slane %v4279_v15, 5  ;;  %4281 = vst [vmem:[#allocation9_spill] sm:$0xff] %v3757_v34 }
 0x13b   : > { %4275 = vst [vmem:[#allocation40_spill] sm:$0xff] %v3735_v18  ;;  %2677 = vmatmul.msk.bf16.gmra.mxu3 %vm721_vm4, %v3731_v60  ;;  %v4282_v18 = vld [vmem:[#allocation8_spill] sm:$0xff] }
 0x13c   : > { %4278 = vst [vmem:[#allocation42_spill] sm:$0xff] %v3750_v7 }
 0x13d   : > { %v1634_v11 = vpop.f32.mrf.mxu0 }
 0x13e   : > { %v1478_v54 = vpop.f32.mrf.mxu3  ;;  %v1028_v46 = vpop.f32.mrf.mxu1 }
 0x13f   : > { %v1546_v22 = vadd.f32 %v1478_v54, %v1412_v28  ;;  %v1205_v54 = vrot.slane %v4280_v24, 5 }
 0x140   : > { %2694 = vmatmul.msk.bf16.gmra.mxu0 %vm721_vm4, %v4276_v5  ;;  %v2641_v5 = vrot.slane %v4282_v18, 9 }
 0x141   : > { %v1346_v39 = vpop.f32.mrf.mxu2  ;;  %2624 = vmatmul.msk.bf16.gmra.mxu1 %vm721_vm4, %v3731_v60  ;;  %v3748_v38 = vadd.f32 %v1634_v11, %v1546_v22  ;;  %v1204_v11 = vrot.slane %v1202_v58, 4  ;;  %v1029_v22 = vadd.f32 %v1028_v46, %v3496_v9 }
 0x142   : > { %v1413_v51 = vadd.f32 %v1346_v39, %v1026_v61  ;;  %v1203_v39 = vsel %vm3378_vm7, %v2641_v5, %v1202_v58  ;;  %v3775_v5 = vld [vmem:[%s3048_s19 + $0xc0] sm:$0xf] }
 0x143   : > { %4277 = vst [vmem:[#allocation41_spill] sm:$0xff] %v3748_v38  ;;  %v1244_v24 = vunpack.c.l.b16 %v1203_v39  ;;  %v4284_v38 = vld [vmem:[#allocation13_spill] sm:$0xff]  ;;  %v1571_v39 = vshrl.u32 %v3775_v5, 16 }
 0x144   : > { %4285 = vst [vmem:[#allocation8_spill] sm:$0xff] %v3775_v5 }
 0x145   : > { %v1636_v30 = vpop.f32.mrf.mxu0 }
 0x146   : > { %v1480_v2 = vpop.f32.mrf.mxu3  ;;  %2657 = vmatmul.msk.bf16.gmra.mxu2 %vm721_vm4, %v3750_v7  ;;  %v1030_v28 = vpop.f32.mrf.mxu1 }
 0x147   : > { %v1547_v43 = vadd.f32 %v1480_v2, %v1413_v51  ;;  %v1206_v51 = vsel %vm3378_vm7, %v1204_v11, %v1205_v54 }
 0x148   : > { %v1245_v9 = vunpack.c.l.b16 %v1206_v51 }
 0x149   : > { %v1349_v47 = vpop.f32.mrf.mxu2  ;;  %v3761_v31 = vadd.f32 %v1636_v30, %v1547_v43  ;;  %v1031_v30 = vadd.f32 %v1030_v28, %v3514_v29  ;;  %v1574_v29 = vshll.u32 %v3775_v5, 16 }
 0x14a   : > { %v1414_v61 = vadd.f32 %v1349_v47, %v1029_v22  ;;  %v3779_v11 = vpack.c.b16 %v1245_v9, %v1244_v24  ;;  %v3782_v22 = vld [vmem:[%s3048_s19 + $0xc4] sm:$0xf]  ;;  %v4289_v47 = vld [vmem:[#allocation15_spill] sm:$0xff]  ;;  %v4290_v24 = vld [vmem:[#allocation16_spill] sm:$0xff] }
 0x14b   : > { %4283 = vst [vmem:[#allocation10_spill] sm:$0xff] %v3761_v31  ;;  %2678 = vmatmul.msk.bf16.gmra.mxu3 %vm721_vm4, %v3757_v34  ;;  %v1580_v28 = vshll.u32 %v3782_v22, 16  ;;  %v1212_v9 = vrot.slane %v4290_v24, 5  ;;  %v1576_v7 = vrot.slane %v1574_v29, 5 }
 0x14c   : > { %4287 = vst [vmem:[#allocation44_spill] sm:$0xff] %v3779_v11 }
 0x14d   : > { %v1639_v15 = vpop.f32.mrf.mxu0  ;;  %4288 = vst [vmem:[#allocation45_spill] sm:$0xff] %v3782_v22 }
 0x14e   : > { %v1483_v18 = vpop.f32.mrf.mxu3  ;;  %v1033_v2 = vpop.f32.mrf.mxu1 }
 0x14f   : > { %v1548_v46 = vadd.f32 %v1483_v18, %v1414_v61  ;;  %v1209_v61 = vrot.slane %v4289_v47, 5  ;;  %v1584_v18 = vshrl.u32 %v3782_v22, 16  ;;  %v1034_v5 = vadd.f32 %v1033_v2, %v3534_v48 }
 0x150   : > { %2695 = vmatmul.msk.bf16.gmra.mxu0 %vm721_vm4, %v4284_v38  ;;  %v1573_v38 = vrot.slane %v1571_v39, 4  ;;  %v1582_v22 = vrot.slane %v1580_v28, 5 }
 0x151   : > { %v1351_v43 = vpop.f32.mrf.mxu2  ;;  %2625 = vmatmul.msk.bf16.gmra.mxu1 %vm721_vm4, %v3757_v34  ;;  %v3777_v58 = vadd.f32 %v1639_v15, %v1548_v46  ;;  %v1586_v60 = vrot.slane %v1584_v18, 4 }
 0x152   : > { %v1415_v54 = vadd.f32 %v1351_v43, %v1031_v30  ;;  %v3793_v30 = vld [vmem:[%s3048_s19 + $0xb4] sm:$0xff]  ;;  %v4291_v43 = vld [vmem:[#allocation14_spill] sm:$0xff]  ;;  %v1577_v2 = vor.u32 %v1576_v7, %v1573_v38 }
 0x153   : > { %4286 = vst [vmem:[#allocation43_spill] sm:$0xff] %v3777_v58  ;;  %v2642_v47 = vrot.slane %v4291_v43, 9  ;;  %v1211_v58 = vrot.slane %v1209_v61, 4  ;;  %v1587_v39 = vor.u32 %v1586_v60, %v1582_v22 }
 0x155   : > { %v1641_v51 = vpop.f32.mrf.mxu0  ;;  %v1588_v38 = vrot.slane %v1587_v39, 4 }
 0x156   : > { %v1485_v31 = vpop.f32.mrf.mxu3  ;;  %2658 = vmatmul.msk.bf16.gmra.mxu2 %vm721_vm4, %v3779_v11  ;;  %v1035_v15 = vpop.f32.mrf.mxu1  ;;  %v3800_v11 = vld [vmem:[%s3048_s19 + $0xc8] sm:$0x1] }
 0x157   : > { %v1549_v46 = vadd.f32 %v1485_v31, %v1415_v54  ;;  %v1210_v31 = vsel %vm3378_vm7, %v2642_v47, %v1209_v61  ;;  %v1213_v54 = vsel %vm3378_vm7, %v1211_v58, %v1212_v9  ;;  %v1590_v29 = vshll.u32 %v3800_v11, 16 }
 0x158   : > { %v1246_v18 = vunpack.c.l.b16 %v1210_v31  ;;  %v1036_v24 = vadd.f32 %v1035_v15, %v3555_v63  ;;  %v1578_v58 = vrot.slane %v1577_v2, 4 }
 0x159   : > { %v1354_v34 = vpop.f32.mrf.mxu2  ;;  %v3797_v49 = vadd.f32 %v1641_v51, %v1549_v46  ;;  %v1592_v60 = vrot.slane %v1590_v29, 5 }
 0x15a   : > { %v1416_v17 = vadd.f32 %v1354_v34, %v1034_v5  ;;  %v1247_v34 = vunpack.c.l.b16 %v1213_v54  ;;  %v3825_v54 = vld [vmem:[%s3048_s19 + $0xc0] sm:$0xff] }
 0x15b   : > { %2679 = vmatmul.msk.bf16.gmra.mxu3 %vm721_vm4, %v3793_v30  ;;  %v1593_v63 = vsel %vm3075_vm3, %v1588_v38, %v1592_v60 }
 0x15c   : > { %v3816_v46 = vpack.c.b16 %v1247_v34, %v1246_v18  ;;  %v1597_v39 = vunpack.c.l.b16 %v1593_v63 }
 0x15d   : > { %v1644_v48 = vpop.f32.mrf.mxu0 }
 0x15e   : > { %v1488_v28 = vpop.f32.mrf.mxu3  ;;  %v1038_v51 = vpop.f32.mrf.mxu1 }
 0x15f   : > { %v1550_v5 = vadd.f32 %v1488_v28, %v1416_v17  ;;  %v1583_v17 = vsel %vm3075_vm3, %v1578_v58, %v1582_v22 }
 0x160   : > { %2696 = vmatmul.msk.bf16.gmra.mxu0 %vm721_vm4, %v3387_v53  ;;  %v1596_v2 = vunpack.c.l.b16 %v1583_v17 }
 0x161   : > { %v1356_v61 = vpop.f32.mrf.mxu2  ;;  %2626 = vmatmul.msk.bf16.gmra.mxu1 %vm721_vm4, %v3793_v30  ;;  %v3814_v7 = vadd.f32 %v1644_v48, %v1550_v5  ;;  %v1039_v48 = vadd.f32 %v1038_v51, %v3576_v26 }
 0x162   : > { %v1417_v9 = vadd.f32 %v1356_v61, %v1036_v24  ;;  %v3832_v22 = vpack.c.b16 %v1597_v39, %v1596_v2 }
 0x165   : > { %v1646_v43 = vpop.f32.mrf.mxu0 }
 0x166   : > { %v1490_v15 = vpop.f32.mrf.mxu3  ;;  %2659 = vmatmul.msk.bf16.gmra.mxu2 %vm721_vm4, %v3816_v46  ;;  %v1040_v47 = vpop.f32.mrf.mxu1 }
 0x167   : > { %v1551_v31 = vadd.f32 %v1490_v15, %v1417_v9  ;;  %v1041_v26 = vadd.f32 %v1040_v47, %v3593_v0 }
 0x169   : > { %v1359_v29 = vpop.f32.mrf.mxu2  ;;  %v3828_v28 = vadd.f32 %v1646_v43, %v1551_v31 }
 0x16a   : > { %v1418_v18 = vadd.f32 %v1359_v29, %v1039_v48 }
 0x16b   : > { %2680 = vmatmul.msk.bf16.gmra.mxu3 %vm721_vm4, %v3825_v54 }
 0x16d   : > { %v1649_v34 = vpop.f32.mrf.mxu0 }
 0x16e   : > { %v1493_v5 = vpop.f32.mrf.mxu3  ;;  %v1043_v24 = vpop.f32.mrf.mxu1 }
 0x16f   : > { %v1552_v61 = vadd.f32 %v1493_v5, %v1418_v18  ;;  %v1044_v63 = vadd.f32 %v1043_v24, %v3478_v16 }
 0x170   : > { %2697 = vmatmul.msk.bf16.gmra.mxu0 %vm721_vm4, %v3832_v22 }
 0x171   : > { %v1361_v51 = vpop.f32.mrf.mxu2  ;;  %2700 = vmatmul.msk.bf16.vlgmr.msra.gmra.mxu1 %vm721_vm4, %v3412_v55  ;;  %v3839_v58 = vadd.f32 %v1649_v34, %v1552_v61 }
 0x172   : > { %v1419_v38 = vadd.f32 %v1361_v51, %v1041_v26 }
 0x175   : > { %v1651_v60 = vpop.f32.mrf.mxu0 }
 0x176   : > { %v1495_v9 = vpop.f32.mrf.mxu3  ;;  %2721 = vmatmul.msk.bf16.vlgmr.msra.gmra.mxu2 %vm721_vm4, %v3424_v6  ;;  %v1045_v43 = vpop.f32.mrf.mxu1 }
 0x177   : > { %v1553_v17 = vadd.f32 %v1495_v9, %v1419_v38  ;;  %v1046_v6 = vadd.f32 %v1045_v43, %v3500_v57 }
 0x179   : > { %v1364_v15 = vpop.f32.mrf.mxu2  ;;  %v3844_v31 = vadd.f32 %v1651_v60, %v1553_v17 }
 0x17a   : > { %v1420_v0 = vadd.f32 %v1364_v15, %v1044_v63 }
 0x17b   : > { %2738 = vmatmul.msk.bf16.vlgmr.msra.gmra.mxu3 %vm721_vm4, %v3315_v45 }
 0x17d   : > { %v1654_v55 = vpop.f32.mrf.mxu0 }
 0x17e   : > { %v1498_v47 = vpop.f32.mrf.mxu3  ;;  %v1048_v48 = vpop.f32.mrf.mxu1 }
 0x17f   : > { %v1554_v2 = vadd.f32 %v1498_v47, %v1420_v0  ;;  %v1049_v24 = vadd.f32 %v1048_v48, %v3520_v59 }
 0x180   : > { %2756 = vmatmul.msk.bf16.vlgmr.msra.gmra.mxu0 %vm721_vm4, %v3438_v52 }
 0x181   : > { %v1366_v39 = vpop.f32.mrf.mxu2  ;;  %2701 = vmatmul.msk.bf16.gmra.mxu1 %vm721_vm4, %v3438_v52  ;;  %v3853_v16 = vadd.f32 %v1654_v55, %v1554_v2 }
 0x182   : > { %v1421_v29 = vadd.f32 %v1366_v39, %v1046_v6 }
 0x185   : > { %v1656_v18 = vpop.f32.mrf.mxu0 }
 0x186   : > { %v1500_v34 = vpop.f32.mrf.mxu3  ;;  %2722 = vmatmul.msk.bf16.gmra.mxu2 %vm721_vm4, %v3444_v41  ;;  %v1050_v45 = vpop.f32.mrf.mxu1 }
 0x187   : > { %v1555_v5 = vadd.f32 %v1500_v34, %v1421_v29  ;;  %v1051_v41 = vadd.f32 %v1050_v45, %v3538_v3 }
 0x189   : > { %v1369_v61 = vpop.f32.mrf.mxu2  ;;  %v3858_v26 = vadd.f32 %v1656_v18, %v1555_v5 }
 0x18a   : > { %v1422_v57 = vadd.f32 %v1369_v61, %v1049_v24 }
 0x18b   : > { %2739 = vmatmul.msk.bf16.gmra.mxu3 %vm721_vm4, %v3405_v20 }
 0x18d   : > { %v1659_v52 = vpop.f32.mrf.mxu0 }
 0x18e   : > { %v1503_v51 = vpop.f32.mrf.mxu3  ;;  %v1053_v38 = vpop.f32.mrf.mxu1 }
 0x18f   : > { %v1556_v60 = vadd.f32 %v1503_v51, %v1422_v57  ;;  %v1054_v0 = vadd.f32 %v1053_v38, %v3557_v23 }
 0x190   : > { %2757 = vmatmul.msk.bf16.gmra.mxu0 %vm721_vm4, %v3458_v40 }
 0x191   : > { %v1371_v9 = vpop.f32.mrf.mxu2  ;;  %2702 = vmatmul.msk.bf16.gmra.mxu1 %vm721_vm4, %v3458_v40  ;;  %v3867_v59 = vadd.f32 %v1659_v52, %v1556_v60 }
 0x192   : > { %v1423_v43 = vadd.f32 %v1371_v9, %v1051_v41 }
 0x195   : > { %v1661_v17 = vpop.f32.mrf.mxu0 }
 0x196   : > { %v1505_v63 = vpop.f32.mrf.mxu3  ;;  %2723 = vmatmul.msk.bf16.gmra.mxu2 %vm721_vm4, %v3466_v8  ;;  %v1055_v20 = vpop.f32.mrf.mxu1 }
 0x197   : > { %v1557_v15 = vadd.f32 %v1505_v63, %v1423_v43  ;;  %v1056_v8 = vadd.f32 %v1055_v20, %v3578_v1  ;;  %v4292_v43 = vld [vmem:[#allocation21_spill] sm:$0xff]  ;;  %v4293_v63 = vld [vmem:[#allocation19_spill] sm:$0xff] }
 0x199   : > { %v1374_v55 = vpop.f32.mrf.mxu2  ;;  %v3872_v47 = vadd.f32 %v1661_v17, %v1557_v15 }
 0x19a   : > { %v1424_v3 = vadd.f32 %v1374_v55, %v1054_v0  ;;  %v4294_v55 = vld [vmem:[#allocation11_spill] sm:$0xff] }
 0x19b   : > { %2740 = vmatmul.msk.bf16.gmra.mxu3 %vm721_vm4, %v3087_v62 }
 0x19d   : > { %v1664_v40 = vpop.f32.mrf.mxu0 }
 0x19e   : > { %v1508_v48 = vpop.f32.mrf.mxu3  ;;  %v1058_v2 = vpop.f32.mrf.mxu1 }
 0x19f   : > { %v1558_v6 = vadd.f32 %v1508_v48, %v1424_v3  ;;  %v1059_v5 = vadd.f32 %v1058_v2, %v3600_v56  ;;  %v4295_v2 = vld [vmem:[#allocation24_spill] sm:$0xff] }
 0x1a0   : > { %2758 = vmatmul.msk.bf16.gmra.mxu0 %vm721_vm4, %v3486_v12 }
 0x1a1   : > { %v1376_v39 = vpop.f32.mrf.mxu2  ;;  %2703 = vmatmul.msk.bf16.gmra.mxu1 %vm721_vm4, %v3486_v12  ;;  %v3881_v23 = vadd.f32 %v1664_v40, %v1558_v6  ;;  %v4296_v6 = vld [vmem:[#allocation20_spill] sm:$0xff] }
 0x1a2   : > { %v1425_v29 = vadd.f32 %v1376_v39, %v1056_v8 }
 0x1a5   : > { %v1666_v18 = vpop.f32.mrf.mxu0 }
 0x1a6   : > { %v1510_v34 = vpop.f32.mrf.mxu3  ;;  %2724 = vmatmul.msk.bf16.gmra.mxu2 %vm721_vm4, %v3494_v27  ;;  %v1060_v62 = vpop.f32.mrf.mxu1 }
 0x1a7   : > { %v1559_v45 = vadd.f32 %v1510_v34, %v1425_v29  ;;  %v1061_v27 = vadd.f32 %v1060_v62, %v3615_v44 }
 0x1a9   : > { %v1379_v24 = vpop.f32.mrf.mxu2  ;;  %v3886_v61 = vadd.f32 %v1666_v18, %v1559_v45  ;;  %v4297_v45 = vld [vmem:[#allocation25_spill] sm:$0xff] }
 0x1aa   : > { %v1426_v1 = vadd.f32 %v1379_v24, %v1059_v5 }
 0x1ab   : > { %2741 = vmatmul.msk.bf16.gmra.mxu3 %vm721_vm4, %v3161_v37 }
 0x1ad   : > { %v1669_v12 = vpop.f32.mrf.mxu0 }
 0x1ae   : > { %v1513_v57 = vpop.f32.mrf.mxu3  ;;  %v1063_v52 = vpop.f32.mrf.mxu1 }
 0x1af   : > { %v1560_v51 = vadd.f32 %v1513_v57, %v1426_v1  ;;  %v1064_v20 = vadd.f32 %v1063_v52, %v4293_v63  ;;  %v4298_v1 = vld [vmem:[#allocation22_spill] sm:$0xff] }
 0x1b0   : > { %2759 = vmatmul.msk.bf16.gmra.mxu0 %vm721_vm4, %v3518_v33 }
 0x1b1   : > { %v1381_v38 = vpop.f32.mrf.mxu2  ;;  %2704 = vmatmul.msk.bf16.gmra.mxu1 %vm721_vm4, %v3518_v33  ;;  %v3895_v56 = vadd.f32 %v1669_v12, %v1560_v51 }
 0x1b2   : > { %v1427_v60 = vadd.f32 %v1381_v38, %v1061_v27  ;;  %v4299_v27 = vld [vmem:[#allocation17_spill] sm:$0xff] }
 0x1b5   : > { %v1671_v41 = vpop.f32.mrf.mxu0 }
 0x1b6   : > { %v1515_v9 = vpop.f32.mrf.mxu3  ;;  %2725 = vmatmul.msk.bf16.gmra.mxu2 %vm721_vm4, %v4292_v43  ;;  %v1065_v37 = vpop.f32.mrf.mxu1  ;;  %v4300_v43 = vld [vmem:[#allocation27_spill] sm:$0xff] }
 0x1b7   : > { %v1561_v17 = vadd.f32 %v1515_v9, %v1427_v60  ;;  %v1066_v8 = vadd.f32 %v1065_v37, %v4296_v6  ;;  %v4301_v37 = vld [vmem:[#allocation23_spill] sm:$0xff] }
 0x1b9   : > { %v1384_v15 = vpop.f32.mrf.mxu2  ;;  %v3900_v0 = vadd.f32 %v1671_v41, %v1561_v17 }
 0x1ba   : > { %v1428_v44 = vadd.f32 %v1384_v15, %v1064_v20 }
 0x1bb   : > { %2742 = vmatmul.msk.bf16.gmra.mxu3 %vm721_vm4, %v4294_v55 }
 0x1bd   : > { %v1674_v33 = vpop.f32.mrf.mxu0 }
 0x1be   : > { %v1518_v3 = vpop.f32.mrf.mxu3  ;;  %v1068_v40 = vpop.f32.mrf.mxu1 }
 0x1bf   : > { %v1562_v48 = vadd.f32 %v1518_v3, %v1428_v44  ;;  %v1069_v12 = vadd.f32 %v1068_v40, %v4298_v1  ;;  %v4306_v1 = vld [vmem:[#allocation28_spill] sm:$0xff] }
 0x1c0   : > { %2760 = vmatmul.msk.bf16.gmra.mxu0 %vm721_vm4, %v4295_v2 }
 0x1c1   : > { %v1386_v39 = vpop.f32.mrf.mxu2  ;;  %2705 = vmatmul.msk.bf16.gmra.mxu1 %vm721_vm4, %v4295_v2  ;;  %v3909_v29 = vadd.f32 %v1674_v33, %v1562_v48  ;;  %v4302_v33 = vld [vmem:[#allocation29_spill] sm:$0xff]  ;;  %v4303_v48 = vld [vmem:[#allocation26_spill] sm:$0xff] }
 0x1c2   : > { %v1429_v18 = vadd.f32 %v1386_v39, %v1066_v8 }
 0x1c5   : > { %v1676_v34 = vpop.f32.mrf.mxu0 }
 0x1c6   : > { %v1520_v62 = vpop.f32.mrf.mxu3  ;;  %2726 = vmatmul.msk.bf16.gmra.mxu2 %vm721_vm4, %v4297_v45  ;;  %v1070_v5 = vpop.f32.mrf.mxu1 }
 0x1c7   : > { %v1563_v24 = vadd.f32 %v1520_v62, %v1429_v18  ;;  %v1071_v17 = vadd.f32 %v1070_v5, %v4301_v37  ;;  %v4304_v18 = vld [vmem:[#allocation5_spill] sm:$0xff] }
 0x1c9   : > { %v1389_v57 = vpop.f32.mrf.mxu2  ;;  %v3914_v52 = vadd.f32 %v1676_v34, %v1563_v24  ;;  %v4305_v24 = vld [vmem:[#allocation31_spill] sm:$0xff] }
 0x1ca   : > { %v1430_v51 = vadd.f32 %v1389_v57, %v1069_v12 }
 0x1cb   : > { %2743 = vmatmul.msk.bf16.gmra.mxu3 %vm721_vm4, %v4299_v27 }
 0x1cd   : > { %v1679_v38 = vpop.f32.mrf.mxu0 }
 0x1ce   : > { %v1523_v60 = vpop.f32.mrf.mxu3  ;;  %v1073_v41 = vpop.f32.mrf.mxu1 }
 0x1cf   : > { %v1564_v9 = vadd.f32 %v1523_v60, %v1430_v51  ;;  %v1074_v2 = vadd.f32 %v1073_v41, %v4303_v48 }
 0x1d0   : > { %2761 = vmatmul.msk.bf16.gmra.mxu0 %vm721_vm4, %v4300_v43 }
 0x1d1   : > { %v1391_v63 = vpop.f32.mrf.mxu2  ;;  %2706 = vmatmul.msk.bf16.gmra.mxu1 %vm721_vm4, %v4300_v43  ;;  %v3923_v20 = vadd.f32 %v1679_v38, %v1564_v9  ;;  %v4307_v43 = vld [vmem:[#allocation30_spill] sm:$0xff] }
 0x1d2   : > { %v1431_v15 = vadd.f32 %v1391_v63, %v1071_v17 }
 0x1d5   : > { %v1681_v44 = vpop.f32.mrf.mxu0 }
 0x1d6   : > { %v1525_v55 = vpop.f32.mrf.mxu3  ;;  %2727 = vmatmul.msk.bf16.gmra.mxu2 %vm721_vm4, %v4302_v33  ;;  %v1075_v3 = vpop.f32.mrf.mxu1 }
 0x1d7   : > { %v1565_v40 = vadd.f32 %v1525_v55, %v1431_v15  ;;  %v1076_v12 = vadd.f32 %v1075_v3, %v4306_v1 }
 0x1d9   : > { %v1394_v6 = vpop.f32.mrf.mxu2  ;;  %v3928_v8 = vadd.f32 %v1681_v44, %v1565_v40  ;;  %v4308_v40 = vld [vmem:[#allocation32_spill] sm:$0xff] }
 0x1da   : > { %v1432_v39 = vadd.f32 %v1394_v6, %v1074_v2 }
 0x1db   : > { %2744 = vmatmul.msk.bf16.gmra.mxu3 %vm721_vm4, %v4304_v18 }
 0x1dd   : > { %v1684_v34 = vpop.f32.mrf.mxu0 }
 0x1de   : > { %v1528_v62 = vpop.f32.mrf.mxu3  ;;  %v1078_v45 = vpop.f32.mrf.mxu1 }
 0x1df   : > { %v1566_v5 = vadd.f32 %v1528_v62, %v1432_v39  ;;  %v1079_v37 = vadd.f32 %v1078_v45, %v4307_v43 }
 0x1e0   : > { %2762 = vmatmul.msk.bf16.gmra.mxu0 %vm721_vm4, %v4305_v24 }
 0x1e1   : > { %v1396_v57 = vpop.f32.mrf.mxu2  ;;  %2707 = vmatmul.msk.bf16.gmra.mxu1 %vm721_vm4, %v4305_v24  ;;  %v3937_v51 = vadd.f32 %v1684_v34, %v1566_v5 }
 0x1e2   : > { %v1433_v27 = vadd.f32 %v1396_v57, %v1076_v12 }
 0x1e5   : > { %v1686_v38 = vpop.f32.mrf.mxu0 }
 0x1e6   : > { %v1530_v60 = vpop.f32.mrf.mxu3  ;;  %2728 = vmatmul.msk.bf16.gmra.mxu2 %vm721_vm4, %v3630_v19  ;;  %v1080_v41 = vpop.f32.mrf.mxu1 }
 0x1e7   : > { %v1567_v9 = vadd.f32 %v1530_v60, %v1433_v27  ;;  %v1081_v19 = vadd.f32 %v1080_v41, %v4308_v40 }
 0x1e9   : > { %v1399_v17 = vpop.f32.mrf.mxu2  ;;  %v3942_v63 = vadd.f32 %v1686_v38, %v1567_v9 }
 0x1ea   : > { %v1434_v15 = vadd.f32 %v1399_v17, %v1079_v37 }
 0x1eb   : > { %2745 = vmatmul.msk.bf16.gmra.mxu3 %vm721_vm4, %v3186_v4 }
 0x1ed   : > { %v1689_v44 = vpop.f32.mrf.mxu0 }
 0x1ee   : > { %v1533_v55 = vpop.f32.mrf.mxu3  ;;  %v1754_v33 = vpop.f32.mrf.mxu1 }
 0x1ef   : > { %v1568_v3 = vadd.f32 %v1533_v55, %v1434_v15  ;;  %v1834_v62 = vadd.f32 %v1754_v33, %v3645_v32  ;;  %v4309_v55 = vld [vmem:[#allocation18_spill] sm:$0xff] }
 0x1f0   : > { %2763 = vmatmul.msk.bf16.gmra.mxu0 %vm721_vm4, %v3647_v10 }
 0x1f1   : > { %v1401_v48 = vpop.f32.mrf.mxu2  ;;  %2708 = vmatmul.msk.bf16.gmra.mxu1 %vm721_vm4, %v3647_v10  ;;  %v3951_v2 = vadd.f32 %v1689_v44, %v1568_v3 }
 0x1f2   : > { %v1435_v6 = vadd.f32 %v1401_v48, %v1081_v19 }
 0x1f5   : > { %v1691_v39 = vpop.f32.mrf.mxu0 }
 0x1f6   : > { %v1535_v18 = vpop.f32.mrf.mxu3  ;;  %2729 = vmatmul.msk.bf16.gmra.mxu2 %vm721_vm4, %v3654_v42  ;;  %v1756_v4 = vpop.f32.mrf.mxu1  ;;  %v3964_v42 = vld [vmem:[%s4188_s2] ss:$0 sm:$0xff] }
 0x1f7   : > { %v1569_v34 = vadd.f32 %v1535_v18, %v1435_v6  ;;  %v1835_v27 = vadd.f32 %v1756_v4, %v3658_v35  ;;  %v4310_v6 = vld [vmem:[#allocation34_spill] sm:$0xff]  ;;  %v4311_v18 = vld [vmem:[#allocation12_spill] sm:$0xff] }
 0x1f9   : > { %v1888_v45 = vpop.f32.mrf.mxu2  ;;  %v3956_v5 = vadd.f32 %v1691_v39, %v1569_v34 }
 0x1fa   : > { %v1968_v10 = vadd.f32 %v1888_v45, %v1834_v62 }
 0x1fb   : > { %2746 = vmatmul.msk.bf16.gmra.mxu3 %vm721_vm4, %v3271_v25 }
 0x1fd   : > { %v2184_v24 = vpop.f32.mrf.mxu0 }
 0x1fe   : > { %v2044_v1 = vpop.f32.mrf.mxu3  ;;  %v1759_v12 = vpop.f32.mrf.mxu1 }
 0x1ff   : > { %v2124_v57 = vadd.f32 %v2044_v1, %v1968_v10  ;;  %v1836_v15 = vadd.f32 %v1759_v12, %v3671_v21  ;;  %v4312_v1 = vld [vmem:[#allocation35_spill] sm:$0xff] }
 0x200   : > { %2764 = vmatmul.msk.bf16.gmra.mxu0 %vm721_vm4, %v3673_v13 }
 0x201   : > { %v2264_v32 = vadd.f32 %v2184_v24, %v2124_v57  ;;  %v1890_v25 = vpop.f32.mrf.mxu2  ;;  %2709 = vmatmul.msk.bf16.gmra.mxu1 %vm721_vm4, %v3673_v13 }
 0x202   : > { %v1969_v60 = vadd.f32 %v1890_v25, %v1835_v27  ;;  %v4313_v27 = vld [vmem:[#allocation33_spill] sm:$0xff] }
 0x203   : > { %v2300_v38 = vadd.f32 %v3964_v42, %v2264_v32 }
 0x205   : > { %v2332_v41 = vmax.f32 %v2300_v38, 0.0  ;;  %v2186_v9 = vpop.f32.mrf.mxu0 }
 0x206   : > { %v2046_v43 = vpop.f32.mrf.mxu3  ;;  %2730 = vmatmul.msk.bf16.gmra.mxu2 %vm721_vm4, %v3680_v50  ;;  %v1761_v37 = vpop.f32.mrf.mxu1 }
 0x207   : > { %2364 = vst [vmem:[%s3976_s9] sm:$0xff] %v2332_v41  ;;  %v2125_v35 = vadd.f32 %v2046_v43, %v1969_v60  ;;  %v1837_v21 = vadd.f32 %v1761_v37, %v4311_v18  ;;  %v4314_v41 = vld [vmem:[#allocation6_spill] sm:$0xff] }
 0x209   : > { %v2265_v17 = vadd.f32 %v2186_v9, %v2125_v35  ;;  %v1893_v13 = vpop.f32.mrf.mxu2 }
 0x20a   : > { %v1970_v33 = vadd.f32 %v1893_v13, %v1836_v15  ;;  %v4315_v13 = vld [vmem:[#allocation38_spill] sm:$0xff] }
 0x20b   : > { %v2301_v44 = vadd.f32 %v3964_v42, %v2265_v17  ;;  %2747 = vmatmul.msk.bf16.gmra.mxu3 %vm721_vm4, %v4309_v55  ;;  %v4316_v55 = vld [vmem:[#allocation36_spill] sm:$0xff] }
 0x20d   : > { %v2333_v3 = vmax.f32 %v2301_v44, 0.0  ;;  %v2189_v40 = vpop.f32.mrf.mxu0 }
 0x20e   : > { %v2049_v50 = vpop.f32.mrf.mxu3  ;;  %v1764_v19 = vpop.f32.mrf.mxu1 }
 0x20f   : > { %2365 = vst [vmem:[%s3976_s9 + $0x8] sm:$0xff] %v2333_v3  ;;  %v2126_v48 = vadd.f32 %v2049_v50, %v1970_v33  ;;  %v1838_v25 = vadd.f32 %v1764_v19, %v4313_v27 }
 0x210   : > { %2765 = vmatmul.msk.bf16.gmra.mxu0 %vm721_vm4, %v4310_v6 }
 0x211   : > { %v2266_v39 = vadd.f32 %v2189_v40, %v2126_v48  ;;  %v1895_v4 = vpop.f32.mrf.mxu2  ;;  %2710 = vmatmul.msk.bf16.gmra.mxu1 %vm721_vm4, %v4310_v6 }
 0x212   : > { %v1971_v62 = vadd.f32 %v1895_v4, %v1837_v21 }
 0x213   : > { %v2302_v34 = vadd.f32 %v3964_v42, %v2266_v39  ;;  %v4317_v39 = vld [vmem:[#allocation39_spill] sm:$0xff] }
 0x215   : > { %v2334_v45 = vmax.f32 %v2302_v34, 0.0  ;;  %v2191_v10 = vpop.f32.mrf.mxu0  ;;  %v4318_v34 = vld [vmem:[#allocation37_spill] sm:$0xff] }
 0x216   : > { %v2051_v24 = vpop.f32.mrf.mxu3  ;;  %2731 = vmatmul.msk.bf16.gmra.mxu2 %vm721_vm4, %v4312_v1  ;;  %v1766_v12 = vpop.f32.mrf.mxu1 }
 0x217   : > { %2366 = vst [vmem:[%s3976_s9 + $0x10] sm:$0xff] %v2334_v45  ;;  %v2127_v57 = vadd.f32 %v2051_v24, %v1971_v62  ;;  %v1839_v33 = vadd.f32 %v1766_v12, %v4316_v55  ;;  %v4319_v24 = vld [vmem:[#allocation7_spill] sm:$0xff] }
 0x219   : > { %v2267_v32 = vadd.f32 %v2191_v10, %v2127_v57  ;;  %v1898_v38 = vpop.f32.mrf.mxu2 }
 0x21a   : > { %v1972_v9 = vadd.f32 %v1898_v38, %v1838_v25  ;;  %v4320_v38 = vld [vmem:[#allocation42_spill] sm:$0xff] }
 0x21b   : > { %v2303_v60 = vadd.f32 %v3964_v42, %v2267_v32  ;;  %2748 = vmatmul.msk.bf16.gmra.mxu3 %vm721_vm4, %v4314_v41  ;;  %v4321_v41 = vld [vmem:[#allocation40_spill] sm:$0xff] }
 0x21d   : > { %v2335_v43 = vmax.f32 %v2303_v60, 0.0  ;;  %v2194_v37 = vpop.f32.mrf.mxu0 }
 0x21e   : > { %v2054_v35 = vpop.f32.mrf.mxu3  ;;  %v1769_v17 = vpop.f32.mrf.mxu1 }
 0x21f   : > { %2367 = vst [vmem:[%s3976_s9 + $0x18] sm:$0xff] %v2335_v43  ;;  %v2128_v15 = vadd.f32 %v2054_v35, %v1972_v9  ;;  %v1840_v62 = vadd.f32 %v1769_v17, %v4318_v34 }
 0x220   : > { %2766 = vmatmul.msk.bf16.gmra.mxu0 %vm721_vm4, %v4315_v13 }
 0x221   : > { %v2268_v44 = vadd.f32 %v2194_v37, %v2128_v15  ;;  %v1900_v3 = vpop.f32.mrf.mxu2  ;;  %2711 = vmatmul.msk.bf16.gmra.mxu1 %vm721_vm4, %v4315_v13 }
 0x222   : > { %v1973_v50 = vadd.f32 %v1900_v3, %v1839_v33 }
 0x223   : > { %v2304_v40 = vadd.f32 %v3964_v42, %v2268_v44  ;;  %v4322_v44 = vld [vmem:[#allocation9_spill] sm:$0xff] }
 0x225   : > { %v2336_v19 = vmax.f32 %v2304_v40, 0.0  ;;  %v2196_v48 = vpop.f32.mrf.mxu0  ;;  %v4323_v40 = vld [vmem:[#allocation41_spill] sm:$0xff] }
 0x226   : > { %v2056_v6 = vpop.f32.mrf.mxu3  ;;  %2732 = vmatmul.msk.bf16.gmra.mxu2 %vm721_vm4, %v4317_v39  ;;  %v1771_v18 = vpop.f32.mrf.mxu1 }
 0x227   : > { %2368 = vst [vmem:[%s3976_s9 + $0x20] sm:$0xff] %v2336_v19  ;;  %v2129_v21 = vadd.f32 %v2056_v6, %v1973_v50  ;;  %v1841_v9 = vadd.f32 %v1771_v18, %v4321_v41  ;;  %v4324_v6 = vld [vmem:[#allocation13_spill] sm:$0xff] }
 0x229   : > { %v2269_v4 = vadd.f32 %v2196_v48, %v2129_v21  ;;  %v1903_v45 = vpop.f32.mrf.mxu2 }
 0x22a   : > { %v1974_v1 = vadd.f32 %v1903_v45, %v1840_v62  ;;  %v4325_v45 = vld [vmem:[#allocation44_spill] sm:$0xff] }
 0x22b   : > { %v2305_v10 = vadd.f32 %v3964_v42, %v2269_v4  ;;  %2749 = vmatmul.msk.bf16.gmra.mxu3 %vm721_vm4, %v4319_v24  ;;  %v4326_v24 = vld [vmem:[#allocation10_spill] sm:$0xff] }
 0x22d   : > { %v2337_v12 = vmax.f32 %v2305_v10, 0.0  ;;  %v2199_v57 = vpop.f32.mrf.mxu0 }
 0x22e   : > { %v2059_v32 = vpop.f32.mrf.mxu3  ;;  %v1774_v27 = vpop.f32.mrf.mxu1 }
 0x22f   : > { %2369 = vst [vmem:[%s3976_s9 + $0x28] sm:$0xff] %v2337_v12  ;;  %v2130_v25 = vadd.f32 %v2059_v32, %v1974_v1  ;;  %v1842_v50 = vadd.f32 %v1774_v27, %v4323_v40 }
 0x230   : > { %2767 = vmatmul.msk.bf16.gmra.mxu0 %vm721_vm4, %v4320_v38 }
 0x231   : > { %v2270_v60 = vadd.f32 %v2199_v57, %v2130_v25  ;;  %v1905_v43 = vpop.f32.mrf.mxu2  ;;  %2712 = vmatmul.msk.bf16.gmra.mxu1 %vm721_vm4, %v4320_v38 }
 0x232   : > { %v1975_v35 = vadd.f32 %v1905_v43, %v1841_v9  ;;  %v4327_v43 = vld [vmem:[#allocation43_spill] sm:$0xff] }
 0x233   : > { %v2306_v37 = vadd.f32 %v3964_v42, %v2270_v60 }
 0x235   : > { %v2338_v17 = vmax.f32 %v2306_v37, 0.0  ;;  %v2201_v15 = vpop.f32.mrf.mxu0 }
 0x236   : > { %v2061_v13 = vpop.f32.mrf.mxu3  ;;  %2733 = vmatmul.msk.bf16.gmra.mxu2 %vm721_vm4, %v4322_v44  ;;  %v1776_v55 = vpop.f32.mrf.mxu1 }
 0x237   : > { %2370 = vst [vmem:[%s3976_s9 + $0x30] sm:$0xff] %v2338_v17  ;;  %v2131_v33 = vadd.f32 %v2061_v13, %v1975_v35  ;;  %v1843_v1 = vadd.f32 %v1776_v55, %v4326_v24  ;;  %v4328_v55 = vld [vmem:[#allocation45_spill] sm:$0xff] }
 0x239   : > { %v2271_v3 = vadd.f32 %v2201_v15, %v2131_v33  ;;  %v1908_v19 = vpop.f32.mrf.mxu2  ;;  %v1729_v33 = vrot.slane %v4328_v55, 5 }
 0x23a   : > { %v1976_v39 = vadd.f32 %v1908_v19, %v1842_v50 }
 0x23b   : > { %v2307_v48 = vadd.f32 %v3964_v42, %v2271_v3  ;;  %2750 = vmatmul.msk.bf16.gmra.mxu3 %vm721_vm4, %v4324_v6  ;;  %v4041_v3 = vld [vmem:[%s3048_s19 + $0xcc] sm:$0xf] }
 0x23d   : > { %v2339_v18 = vmax.f32 %v2307_v48, 0.0  ;;  %v2204_v21 = vpop.f32.mrf.mxu0  ;;  %v4329_v48 = vld [vmem:[#allocation8_spill] sm:$0xff] }
 0x23e   : > { %v2064_v4 = vpop.f32.mrf.mxu3  ;;  %v1779_v34 = vpop.f32.mrf.mxu1  ;;  %v2698_v6 = vrot.slane %v4329_v48, 9 }
 0x23f   : > { %2371 = vst [vmem:[%s3976_s9 + $0x38] sm:$0xff] %v2339_v18  ;;  %v2132_v62 = vadd.f32 %v2064_v4, %v1976_v39  ;;  %v1844_v37 = vadd.f32 %v1779_v34, %v4327_v43  ;;  %v2004_v39 = vshll.u32 %v4041_v3, 16 }
 0x240   : > { %2768 = vmatmul.msk.bf16.gmra.mxu0 %vm721_vm4, %v4325_v45 }
 0x241   : > { %v2272_v10 = vadd.f32 %v2204_v21, %v2132_v62  ;;  %v1910_v12 = vpop.f32.mrf.mxu2  ;;  %2713 = vmatmul.msk.bf16.gmra.mxu1 %vm721_vm4, %v4325_v45  ;;  %v1731_v45 = vrot.slane %v1729_v33, 4 }
 0x242   : > { %v1977_v32 = vadd.f32 %v1910_v12, %v1843_v1  ;;  %v1730_v12 = vsel %vm3378_vm7, %v2698_v6, %v1729_v33 }
 0x243   : > { %v2308_v57 = vadd.f32 %v3964_v42, %v2272_v10  ;;  %v1732_v10 = vrot.slane %v3800_v11, 5  ;;  %v1736_v43 = vunpack.c.l.b16 %v1730_v12 }
 0x245   : > { %v2340_v27 = vmax.f32 %v2308_v57, 0.0  ;;  %v2206_v25 = vpop.f32.mrf.mxu0 }
 0x246   : > { %v2066_v38 = vpop.f32.mrf.mxu3  ;;  %2734 = vmatmul.msk.bf16.gmra.mxu2 %vm721_vm4, %v3793_v30  ;;  %v1781_v60 = vpop.f32.mrf.mxu1  ;;  %v4044_v30 = vld [vmem:[%s3048_s19 + $0xd0] sm:$0xf] }
 0x247   : > { %2372 = vst [vmem:[%s3976_s9 + $0x40] sm:$0xff] %v2340_v27  ;;  %v2133_v41 = vadd.f32 %v2066_v38, %v1977_v32  ;;  %v2010_v18 = vshll.u32 %v4044_v30, 16  ;;  %v2014_v21 = vshrl.u32 %v4044_v30, 16  ;;  %v1845_v34 = vadd.f32 %v1781_v60, %v3797_v49 }
 0x248   : > { %v2006_v32 = vrot.slane %v2004_v39, 5  ;;  %v1733_v60 = vsel %vm3378_vm7, %v1731_v45, %v1732_v10 }
 0x249   : > { %v2273_v9 = vadd.f32 %v2206_v25, %v2133_v41  ;;  %v1913_v35 = vpop.f32.mrf.mxu2  ;;  %v2012_v27 = vrot.slane %v2010_v18, 5  ;;  %v2016_v25 = vrot.slane %v2014_v21, 4  ;;  %v2159_v18 = vrot.slane %v4044_v30, 5 }
 0x24a   : > { %v1978_v15 = vadd.f32 %v1913_v35, %v1844_v37  ;;  %v1737_v37 = vunpack.c.l.b16 %v1733_v60 }
 0x24b   : > { %v2309_v17 = vadd.f32 %v3964_v42, %v2273_v9  ;;  %2751 = vmatmul.msk.bf16.gmra.mxu3 %vm721_vm4, %v3387_v53  ;;  %v2001_v53 = vshrl.u32 %v4041_v3, 16  ;;  %v2161_v30 = vrot.slane %v2159_v18, 4 }
 0x24d   : > { %v2341_v13 = vmax.f32 %v2309_v17, 0.0  ;;  %v2209_v44 = vpop.f32.mrf.mxu0  ;;  %v2003_v57 = vrot.slane %v2001_v53, 4  ;;  %v2017_v17 = vor.u32 %v2016_v25, %v2012_v27 }
 0x24e   : > { %v2069_v40 = vpop.f32.mrf.mxu3  ;;  %v1784_v50 = vpop.f32.mrf.mxu1 }
 0x24f   : > { %2373 = vst [vmem:[%s3976_s9 + $0x48] sm:$0xff] %v2341_v13  ;;  %v2134_v19 = vadd.f32 %v2069_v40, %v1978_v15  ;;  %v2007_v35 = vor.u32 %v2006_v32, %v2003_v57  ;;  %v2018_v48 = vrot.slane %v2017_v17, 4 }
 0x250   : > { %2769 = vmatmul.msk.bf16.gmra.mxu0 %vm721_vm4, %v3816_v46 }
 0x251   : > { %v2274_v4 = vadd.f32 %v2209_v44, %v2134_v19  ;;  %v1915_v62 = vpop.f32.mrf.mxu2  ;;  %2714 = vmatmul.msk.bf16.gmra.mxu1 %vm721_vm4, %v3816_v46  ;;  %v282_v46 = vld [vmem:[%s3048_s19 + $0xd4] sm:$0x1]  ;;  %v1846_v44 = vadd.f32 %v1784_v50, %v3814_v7  ;;  %v2008_v19 = vrot.slane %v2007_v35, 4 }
 0x252   : > { %v1979_v1 = vadd.f32 %v1915_v62, %v1845_v34  ;;  %v2020_v15 = vshll.u32 %v282_v46, 16  ;;  %v2754_v34 = vrot.slane %v4041_v3, 9 }
 0x253   : > { %v2310_v24 = vadd.f32 %v3964_v42, %v2274_v4  ;;  %v2013_v50 = vsel %vm3075_vm3, %v2008_v19, %v2012_v27 }
 0x254   : > { %v2022_v6 = vrot.slane %v2020_v15, 5  ;;  %v2026_v32 = vunpack.c.l.b16 %v2013_v50  ;;  %v2160_v3 = vsel %vm3378_vm7, %v2754_v34, %v2159_v18 }
 0x255   : > { %v2342_v38 = vmax.f32 %v2310_v24, 0.0  ;;  %v2211_v49 = vpop.f32.mrf.mxu0  ;;  %v2162_v24 = vrot.slane %v282_v46, 5 }
 0x256   : > { %v2071_v41 = vpop.f32.mrf.mxu3  ;;  %2735 = vmatmul.msk.bf16.gmra.mxu2 %vm721_vm4, %v3825_v54  ;;  %v1786_v11 = vpop.f32.mrf.mxu1  ;;  %v1738_v54 = vpack.c.b16 %v1737_v37, %v1736_v43 }
 0x257   : > { %2374 = vst [vmem:[%s3976_s9 + $0x50] sm:$0xff] %v2342_v38  ;;  %v2135_v9 = vadd.f32 %v2071_v41, %v1979_v1  ;;  %v1847_v45 = vadd.f32 %v1786_v11, %v3828_v28  ;;  %v2794_v1 = vld [vmem:[%s3048_s19 + $0xcc] sm:$0xff]  ;;  %v2163_v28 = vsel %vm3378_vm7, %v2161_v30, %v2162_v24  ;;  %v2166_v41 = vunpack.c.l.b16 %v2160_v3  ;;  %s2411_s19 = scalar_lea.hbm %s4189_s3, %s2795_s10 }
 0x258   : > { %v2167_v11 = vunpack.c.l.b16 %v2163_v28  ;;  %s2414_s23 = sshll.u32 %s2411_s19, 4  ;;  %s2415_s23 = int_to_ptr.hbm [resolvable:$true] %s2414_s23 }
 0x259   : > { %v2275_v13 = vadd.f32 %v2211_v49, %v2135_v9  ;;  %v1918_v55 = vpop.f32.mrf.mxu2  ;;  %s2880_s26 = sshra.s32 %s2415_s23, 4  ;;  %s2881_s26 = int_to_ptr.hbm [resolvable:$true] %s2880_s26 }
 0x25a   : > { %v1980_v40 = vadd.f32 %v1918_v55, %v1846_v44  ;;  %v2168_v17 = vpack.c.b16 %v2167_v11, %v2166_v41  ;;  %s2882_s27 = scalar_lea.hbm %s2881_s26, 256  ;;  %p2887_p1 = scmp.lt.s32.totalorder %s2881_s26, %s4189_s3 }
 0x25b   : > { %v2311_v33 = vadd.f32 %v3964_v42, %v2275_v13  ;;  %2752 = vmatmul.msk.bf16.gmra.mxu3 %vm721_vm4, %v3832_v22  ;;  %v2023_v22 = vsel %vm3075_vm3, %v2018_v48, %v2022_v6  ;;  %p2883_p12 = scmp.ne.s32.totalorder %s2881_s26, %s2882_s27  ;;  %p2888_p2 = scmp.lt.s32.totalorder %s2886_s30, %s2882_s27 }
 0x25c   : > { %v2027_v27 = vunpack.c.l.b16 %v2023_v22 }
 0x25d   : > { %v2343_v53 = vmax.f32 %v2311_v33, 0.0  ;;  %v2214_v39 = vpop.f32.mrf.mxu0  ;;  %p2884_p13 = pnand %p2883_p12, %p3008_p4  ;;  %p2889_p3 = por %p2888_p2, %p2887_p1 }
 0x25e   : > { %v2074_v21 = vpop.f32.mrf.mxu3  ;;  %v1789_v4 = vpop.f32.mrf.mxu1  ;;  %v2028_v46 = vpack.c.b16 %v2027_v27, %v2026_v32 }
 0x25f   : > { %2375 = vst [vmem:[%s3976_s9 + $0x58] sm:$0xff] %v2343_v53  ;;  %v2136_v7 = vadd.f32 %v2074_v21, %v1980_v40  ;;  %v1848_v43 = vadd.f32 %v1789_v4, %v3839_v58  ;;  %p2885_p0 = pneg %p2884_p13 }
 0x260   : > { %2770 = vmatmul.msk.bf16.gmra.mxu0 %vm721_vm4, %v1738_v54 }
 0x261   : > { %v2276_v62 = vadd.f32 %v2214_v39, %v2136_v7  ;;  %v1920_v10 = vpop.f32.mrf.mxu2  ;;  %2715 = vmatmul.msk.bf16.gmra.mxu1 %vm721_vm4, %v1738_v54  ;;  %p2890_p5 = pnand %p2889_p3, %p2885_p0 }
 0x262   : > { %v1981_v57 = vadd.f32 %v1920_v10, %v1847_v45 }
 0x263   : > { %v2312_v12 = vadd.f32 %v3964_v42, %v2276_v62 }
 0x265   : > { %v2344_v25 = vmax.f32 %v2312_v12, 0.0  ;;  %v2216_v36 = vpop.f32.mrf.mxu0 }
 0x266   : > { %v2076_v38 = vpop.f32.mrf.mxu3  ;;  %2736 = vmatmul.msk.bf16.gmra.mxu2 %vm721_vm4, %v2794_v1  ;;  %v1791_v49 = vpop.f32.mrf.mxu1 }
 0x267   : > { %2376 = vst [vmem:[%s3976_s9 + $0x60] sm:$0xff] %v2344_v25  ;;  %v2137_v60 = vadd.f32 %v2076_v38, %v1981_v57  ;;  %v1849_v54 = vadd.f32 %v1791_v49, %v3844_v31 }
 0x269   : > { %v2277_v9 = vadd.f32 %v2216_v36, %v2137_v60  ;;  %v1923_v37 = vpop.f32.mrf.mxu2 }
 0x26a   : > { %v1982_v14 = vadd.f32 %v1923_v37, %v1848_v43 }
 0x26b   : > { %v2313_v35 = vadd.f32 %v3964_v42, %v2277_v9  ;;  %2753 = vmatmul.msk.bf16.gmra.mxu3 %vm721_vm4, %v2028_v46 }
 0x26d   : > { %v2345_v15 = vmax.f32 %v2313_v35, 0.0  ;;  %v2219_v13 = vpop.f32.mrf.mxu0 }
 0x26e   : > { %v2079_v44 = vpop.f32.mrf.mxu3  ;;  %v1794_v55 = vpop.f32.mrf.mxu1 }
 0x26f   : > { %2377 = vst [vmem:[%s3976_s9 + $0x68] sm:$0xff] %v2345_v15  ;;  %v2138_v33 = vadd.f32 %v2079_v44, %v1982_v14  ;;  %v1850_v7 = vadd.f32 %v1794_v55, %v3853_v16 }
 0x270   : > { %2771 = vmatmul.msk.bf16.gmra.mxu0 %vm721_vm4, %v2168_v17 }
 0x271   : > { %v2278_v40 = vadd.f32 %v2219_v13, %v2138_v33  ;;  %v1925_v58 = vpop.f32.mrf.mxu2 }
 0x272   : > { %v1983_v48 = vadd.f32 %v1925_v58, %v1849_v54 }
 0x273   : > { %v2314_v19 = vadd.f32 %v3964_v42, %v2278_v40 }
 0x275   : > { %v2346_v6 = vmax.f32 %v2314_v19, 0.0  ;;  %v2221_v53 = vpop.f32.mrf.mxu0 }
 0x276   : > { %v2081_v39 = vpop.f32.mrf.mxu3  ;;  %v1796_v18 = vpop.f32.mrf.mxu1 }
 0x277   : > { %2378 = vst [vmem:[%s3976_s9 + $0x70] sm:$0xff] %v2346_v6  ;;  %v2139_v21 = vadd.f32 %v2081_v39, %v1983_v48  ;;  %v1851_v1 = vadd.f32 %v1796_v18, %v3858_v26 }
 0x279   : > { %v2279_v4 = vadd.f32 %v2221_v53, %v2139_v21  ;;  %v1928_v50 = vpop.f32.mrf.mxu2 }
 0x27a   : > { %v1984_v34 = vadd.f32 %v1928_v50, %v1850_v7 }
 0x27b   : > { %v2315_v22 = vadd.f32 %v3964_v42, %v2279_v4 }
 0x27d   : > { %v2347_v31 = vmax.f32 %v2315_v22, 0.0  ;;  %v2224_v62 = vpop.f32.mrf.mxu0 }
 0x27e   : > { %v2084_v45 = vpop.f32.mrf.mxu3  ;;  %v1799_v10 = vpop.f32.mrf.mxu1 }
 0x27f   : > { %2379 = vst [vmem:[%s3976_s9 + $0x78] sm:$0xff] %v2347_v31  ;;  %v2140_v30 = vadd.f32 %v2084_v45, %v1984_v34  ;;  %v1852_v38 = vadd.f32 %v1799_v10, %v3867_v59 }
 0x281   : > { %v2280_v24 = vadd.f32 %v2224_v62, %v2140_v30  ;;  %v1930_v12 = vpop.f32.mrf.mxu2 }
 0x282   : > { %v1985_v32 = vadd.f32 %v1930_v12, %v1851_v1 }
 0x283   : > { %v2316_v57 = vadd.f32 %v3964_v42, %v2280_v24 }
 0x285   : > { %v2348_v16 = vmax.f32 %v2316_v57, 0.0  ;;  %v2226_v27 = vpop.f32.mrf.mxu0 }
 0x286   : > { %v2086_v25 = vpop.f32.mrf.mxu3  ;;  %v1801_v36 = vpop.f32.mrf.mxu1 }
 0x287   : > { %2380 = vst [vmem:[%s3976_s9 + $0x80] sm:$0xff] %v2348_v16  ;;  %v2141_v3 = vadd.f32 %v2086_v25, %v1985_v32  ;;  %v1853_v35 = vadd.f32 %v1801_v36, %v3872_v47 }
 0x289   : > { %v2281_v28 = vadd.f32 %v2226_v27, %v2141_v3  ;;  %v1933_v49 = vpop.f32.mrf.mxu2 }
 0x28a   : > { %v1986_v46 = vadd.f32 %v1933_v49, %v1852_v38 }
 0x28b   : > { %v2317_v60 = vadd.f32 %v3964_v42, %v2281_v28 }
 0x28d   : > { %v2349_v26 = vmax.f32 %v2317_v60, 0.0  ;;  %v2229_v41 = vpop.f32.mrf.mxu0 }
 0x28e   : > { %v2089_v11 = vpop.f32.mrf.mxu3  ;;  %v1804_v9 = vpop.f32.mrf.mxu1 }
 0x28f   : > { %2381 = vst [vmem:[%s3976_s9 + $0x88] sm:$0xff] %v2349_v26  ;;  %v2142_v43 = vadd.f32 %v2089_v11, %v1986_v46  ;;  %v1854_v54 = vadd.f32 %v1804_v9, %v3881_v23 }
 0x291   : > { %v2282_v37 = vadd.f32 %v2229_v41, %v2142_v43  ;;  %v1935_v14 = vpop.f32.mrf.mxu2 }
 0x292   : > { %v1987_v15 = vadd.f32 %v1935_v14, %v1853_v35 }
 0x293   : > { %v2318_v17 = vadd.f32 %v3964_v42, %v2282_v37 }
 0x295   : > { %v2350_v59 = vmax.f32 %v2318_v17, 0.0  ;;  %v2231_v13 = vpop.f32.mrf.mxu0 }
 0x296   : > { %v2091_v44 = vpop.f32.mrf.mxu3  ;;  %v1806_v55 = vpop.f32.mrf.mxu1 }
 0x297   : > { %2382 = vst [vmem:[%s3976_s9 + $0x90] sm:$0xff] %v2350_v59  ;;  %v2143_v33 = vadd.f32 %v2091_v44, %v1987_v15  ;;  %v1855_v4 = vadd.f32 %v1806_v55, %v3886_v61 }
 0x299   : > { %v2283_v40 = vadd.f32 %v2231_v13, %v2143_v33  ;;  %v1938_v58 = vpop.f32.mrf.mxu2 }
 0x29a   : > { %v1988_v48 = vadd.f32 %v1938_v58, %v1854_v54 }
 0x29b   : > { %v2319_v19 = vadd.f32 %v3964_v42, %v2283_v40 }
 0x29d   : > { %v2351_v47 = vmax.f32 %v2319_v19, 0.0  ;;  %v2234_v6 = vpop.f32.mrf.mxu0 }
 0x29e   : > { %v2094_v53 = vpop.f32.mrf.mxu3  ;;  %v1809_v39 = vpop.f32.mrf.mxu1 }
 0x29f   : > { %2383 = vst [vmem:[%s3976_s9 + $0x98] sm:$0xff] %v2351_v47  ;;  %v2144_v18 = vadd.f32 %v2094_v53, %v1988_v48  ;;  %v1856_v30 = vadd.f32 %v1809_v39, %v3895_v56 }
 0x2a1   : > { %v2284_v21 = vadd.f32 %v2234_v6, %v2144_v18  ;;  %v1940_v7 = vpop.f32.mrf.mxu2 }
 0x2a2   : > { %v1989_v22 = vadd.f32 %v1940_v7, %v1855_v4 }
 0x2a3   : > { %v2320_v50 = vadd.f32 %v3964_v42, %v2284_v21 }
 0x2a5   : > { %v2352_v23 = vmax.f32 %v2320_v50, 0.0  ;;  %v2236_v34 = vpop.f32.mrf.mxu0 }
 0x2a6   : > { %v2096_v31 = vpop.f32.mrf.mxu3  ;;  %v1811_v62 = vpop.f32.mrf.mxu1 }
 0x2a7   : > { %2384 = vst [vmem:[%s3976_s9 + $0xa0] sm:$0xff] %v2352_v23  ;;  %v2145_v45 = vadd.f32 %v2096_v31, %v1989_v22  ;;  %v1857_v36 = vadd.f32 %v1811_v62, %v3900_v0 }
 0x2a9   : > { %v2285_v10 = vadd.f32 %v2236_v34, %v2145_v45  ;;  %v1943_v24 = vpop.f32.mrf.mxu2 }
 0x2aa   : > { %v1990_v12 = vadd.f32 %v1943_v24, %v1856_v30 }
 0x2ab   : > { %v2321_v1 = vadd.f32 %v3964_v42, %v2285_v10 }
 0x2ad   : > { %v2353_v61 = vmax.f32 %v2321_v1, 0.0  ;;  %v2239_v57 = vpop.f32.mrf.mxu0 }
 0x2ae   : > { %v2099_v32 = vpop.f32.mrf.mxu3  ;;  %v1814_v16 = vpop.f32.mrf.mxu1 }
 0x2af   : > { %2385 = vst [vmem:[%s3976_s9 + $0xa8] sm:$0xff] %v2353_v61  ;;  %v2146_v27 = vadd.f32 %v2099_v32, %v1990_v12  ;;  %v1858_v11 = vadd.f32 %v1814_v16, %v3909_v29 }
 0x2b1   : > { %v2286_v25 = vadd.f32 %v2239_v57, %v2146_v27  ;;  %v1945_v3 = vpop.f32.mrf.mxu2 }
 0x2b2   : > { %v1991_v38 = vadd.f32 %v1945_v3, %v1857_v36 }
 0x2b3   : > { %v2322_v28 = vadd.f32 %v3964_v42, %v2286_v25 }
 0x2b5   : > { %v2354_v56 = vmax.f32 %v2322_v28, 0.0  ;;  %v2241_v49 = vpop.f32.mrf.mxu0 }
 0x2b6   : > { %v2101_v60 = vpop.f32.mrf.mxu3  ;;  %v1816_v46 = vpop.f32.mrf.mxu1 }
 0x2b7   : > { %2386 = vst [vmem:[%s3976_s9 + $0xb0] sm:$0xff] %v2354_v56  ;;  %v2147_v26 = vadd.f32 %v2101_v60, %v1991_v38  ;;  %v1859_v13 = vadd.f32 %v1816_v46, %v3914_v52 }
 0x2b9   : > { %v2287_v41 = vadd.f32 %v2241_v49, %v2147_v26  ;;  %v1948_v9 = vpop.f32.mrf.mxu2 }
 0x2ba   : > { %v1992_v37 = vadd.f32 %v1948_v9, %v1858_v11 }
 0x2bb   : > { %v2323_v43 = vadd.f32 %v3964_v42, %v2287_v41 }
 0x2bd   : > { %v2355_v0 = vmax.f32 %v2323_v43, 0.0  ;;  %v2244_v35 = vpop.f32.mrf.mxu0 }
 0x2be   : > { %v2104_v14 = vpop.f32.mrf.mxu3  ;;  %v1819_v17 = vpop.f32.mrf.mxu1 }
 0x2bf   : > { %2387 = vst [vmem:[%s3976_s9 + $0xb8] sm:$0xff] %v2355_v0  ;;  %v2148_v15 = vadd.f32 %v2104_v14, %v1992_v37  ;;  %v1860_v47 = vadd.f32 %v1819_v17, %v3923_v20 }
 0x2c1   : > { %v2288_v59 = vadd.f32 %v2244_v35, %v2148_v15  ;;  %v1950_v44 = vpop.f32.mrf.mxu2 }
 0x2c2   : > { %v1993_v33 = vadd.f32 %v1950_v44, %v1859_v13 }
 0x2c3   : > { %v2324_v55 = vadd.f32 %v3964_v42, %v2288_v59 }
 0x2c5   : > { %v2356_v29 = vmax.f32 %v2324_v55, 0.0  ;;  %v2246_v40 = vpop.f32.mrf.mxu0 }
 0x2c6   : > { %v2106_v54 = vpop.f32.mrf.mxu3  ;;  %v1821_v58 = vpop.f32.mrf.mxu1 }
 0x2c7   : > { %2388 = vst [vmem:[%s3976_s9 + $0xc0] sm:$0xff] %v2356_v29  ;;  %v2149_v19 = vadd.f32 %v2106_v54, %v1993_v33  ;;  %v1861_v22 = vadd.f32 %v1821_v58, %v3928_v8 }
 0x2c9   : > { %v2289_v48 = vadd.f32 %v2246_v40, %v2149_v19  ;;  %v1953_v6 = vpop.f32.mrf.mxu2 }
 0x2ca   : > { %v1994_v39 = vadd.f32 %v1953_v6, %v1860_v47 }
 0x2cb   : > { %v2325_v53 = vadd.f32 %v3964_v42, %v2289_v48 }
 0x2cd   : > { %v2357_v52 = vmax.f32 %v2325_v53, 0.0  ;;  %v2249_v18 = vpop.f32.mrf.mxu0 }
 0x2ce   : > { %v2109_v21 = vpop.f32.mrf.mxu3  ;;  %v1824_v7 = vpop.f32.mrf.mxu1 }
 0x2cf   : > { %2389 = vst [vmem:[%s3976_s9 + $0xc8] sm:$0xff] %v2357_v52  ;;  %v2150_v4 = vadd.f32 %v2109_v21, %v1994_v39  ;;  %v1862_v24 = vadd.f32 %v1824_v7, %v3937_v51 }
 0x2d1   : > { %v2290_v50 = vadd.f32 %v2249_v18, %v2150_v4  ;;  %v1955_v23 = vpop.f32.mrf.mxu2 }
 0x2d2   : > { %v1995_v31 = vadd.f32 %v1955_v23, %v1861_v22 }
 0x2d3   : > { %v2326_v34 = vadd.f32 %v3964_v42, %v2290_v50 }
 0x2d5   : > { %v2358_v20 = vmax.f32 %v2326_v34, 0.0  ;;  %v2251_v62 = vpop.f32.mrf.mxu0 }
 0x2d6   : > { %v2111_v45 = vpop.f32.mrf.mxu3  ;;  %v1826_v12 = vpop.f32.mrf.mxu1 }
 0x2d7   : > { %2390 = vst [vmem:[%s3976_s9 + $0xd0] sm:$0xff] %v2358_v20  ;;  %v2151_v10 = vadd.f32 %v2111_v45, %v1995_v31  ;;  %v1863_v36 = vadd.f32 %v1826_v12, %v3942_v63 }
 0x2d9   : > { %v2291_v30 = vadd.f32 %v2251_v62, %v2151_v10  ;;  %v1958_v1 = vpop.f32.mrf.mxu2 }
 0x2da   : > { %v1996_v57 = vadd.f32 %v1958_v1, %v1862_v24 }
 0x2db   : > { %v2327_v61 = vadd.f32 %v3964_v42, %v2291_v30 }
 0x2dd   : > { %v2359_v8 = vmax.f32 %v2327_v61, 0.0  ;;  %v2254_v32 = vpop.f32.mrf.mxu0 }
 0x2de   : > { %v2114_v16 = vpop.f32.mrf.mxu3  ;;  %v1829_v51 = vpop.f32.mrf.mxu1 }
 0x2df   : > { %2391 = vst [vmem:[%s3976_s9 + $0xd8] sm:$0xff] %v2359_v8  ;;  %v2152_v27 = vadd.f32 %v2114_v16, %v1996_v57  ;;  %v1864_v41 = vadd.f32 %v1829_v51, %v3951_v2 }
 0x2e1   : > { %v2292_v25 = vadd.f32 %v2254_v32, %v2152_v27  ;;  %v1960_v3 = vpop.f32.mrf.mxu2 }
 0x2e2   : > { %v1997_v38 = vadd.f32 %v1960_v3, %v1863_v36 }
 0x2e3   : > { %v2328_v28 = vadd.f32 %v3964_v42, %v2292_v25 }
 0x2e5   : > { %v2360_v56 = vmax.f32 %v2328_v28, 0.0  ;;  %v2256_v49 = vpop.f32.mrf.mxu0 }
 0x2e6   : > { %v2116_v60 = vpop.f32.mrf.mxu3  ;;  %v1831_v37 = vpop.f32.mrf.mxu1 }
 0x2e7   : > { %2392 = vst [vmem:[%s3976_s9 + $0xe0] sm:$0xff] %v2360_v56  ;;  %v2153_v46 = vadd.f32 %v2116_v60, %v1997_v38  ;;  %v1865_v15 = vadd.f32 %v1831_v37, %v3956_v5 }
 0x2e9   : > { %v2293_v26 = vadd.f32 %v2256_v49, %v2153_v46  ;;  %v1963_v11 = vpop.f32.mrf.mxu2 }
 0x2ea   : > { %v1998_v43 = vadd.f32 %v1963_v11, %v1864_v41 }
 0x2eb   : > { %v2329_v9 = vadd.f32 %v3964_v42, %v2293_v26 }
 0x2ed   : > { %v2361_v63 = vmax.f32 %v2329_v9, 0.0  ;;  %v2259_v0 = vpop.f32.mrf.mxu0 }
 0x2ee   : > { %v2119_v35 = vpop.f32.mrf.mxu3 }
 0x2ef   : > { %2393 = vst [vmem:[%s3976_s9 + $0xe8] sm:$0xff] %v2361_v63  ;;  %v2154_v14 = vadd.f32 %v2119_v35, %v1998_v43 }
 0x2f1   : > { %v2294_v17 = vadd.f32 %v2259_v0, %v2154_v14  ;;  %v1965_v59 = vpop.f32.mrf.mxu2 }
 0x2f2   : > { %v1999_v2 = vadd.f32 %v1965_v59, %v1865_v15 }
 0x2f3   : > { %v2330_v13 = vadd.f32 %v3964_v42, %v2294_v17 }
 0x2f5   : > { %v2362_v44 = vmax.f32 %v2330_v13, 0.0  ;;  %v2261_v29 = vpop.f32.mrf.mxu0 }
 0x2f6   : > { %v2121_v55 = vpop.f32.mrf.mxu3 }
 0x2f7   : > { %2394 = vst [vmem:[%s3976_s9 + $0xf0] sm:$0xff] %v2362_v44  ;;  %v2155_v33 = vadd.f32 %v2121_v55, %v1999_v2 }
 0x2f9   : > { %v2295_v40 = vadd.f32 %v2261_v29, %v2155_v33 }
 0x2fb   : > { %v2331_v5 = vadd.f32 %v3964_v42, %v2295_v40 }
 0x2fd   : > { %v2363_v54 = vmax.f32 %v2331_v5, 0.0 }
 0x2ff   : > { %2395 = vst [vmem:[%s3976_s9 + $0xf8] sm:$0xff] %v2363_v54 }
 0x300   : > { %2893 = shalt.err (!%p2890_p5)
}
 0x301   : > { %s2946_s5 = smov 128   ;;  %s2947_s7 = smov 8  }
 0x302   : > { %2800 = dma.vmem_to_hbm [thread:$0]  (%p3008_p4), %s2413_s21, 4096, %s2415_s23, %s2397_s15, %s2946_s5, %s2946_s5, %s2947_s7  }
 0x303 PF: > { %p2806_p6 = scmp.ge.s32.totalorder %s2944_s17, 2  ;;  %s2429_s8 = sand.u32 1, %s2924_s12  }
 0x304   : > { %s2430_s9 = scalar_lea.sflag [#allocation3], %s2429_s8 }
 0x305   : > { %p2803_p7 = pnand %p2806_p6, %p3015_p8 }
 0x307   : > { %p2804_p9 = pneg %p2803_p7 }
 0x309   : > { %2919 = dma.done.wait (%p2804_p9), %s2430_s9, 4096  }
 0x30a   : > { %2921 = vsyncadd (%p2804_p9), %s2430_s9, 4294963200  ;;  %s16_s17 = sadd.s32 1, %s2944_s17   ;;  %s4330_s12 = smov %s2928_s13 }
 0x30b   : > { %p13_p10 = scmp.ge.s32.totalorder %s16_s17, 4   ;;  %s4331_s13 = smov %s2932_s14 }
 0x30c   : > { %s4332_s14 = smov %s3021_s25  ;;  %s4333_s15 = smov %s2940_s16 }
 0x30d   : > { %s4334_s16 = smov %s4336_s20  ;;  %15 = sbr.rel (!%p13_p10) target bundleno = 4 (0x4), region = 82 }
 0x312   :  { %2436 = vsyncpa [#allocation3], 1 }
 0x313   :  { %2438 = vsyncpa [#allocation3 + $0x1], 1 }

</bundles_post_ra>
